<compile_context>
chip_gen: v7x
topology: tpu7x:2x2x1
jax: 0.10.0
libtpu: 0.0.40
codegen_flags: <defaults>
</compile_context>

<pallas_src>
import math
from functools import partial

import jax
import jax.numpy as jnp
from jax import lax
from jax.experimental import pallas as pl
from jax.experimental.pallas import tpu as pltpu


# ----------------------------- config ------------------------------------- #
class Config:
    canonical_grid_size_fine = (16, 16, 16)
    scene_aabb = (-1.0, -1.0, -1.0, 1.0, 1.0, 1.0)
    xyz_encoder_degrees = 3
    view_encoder_degrees = 2
    time_encoder_degrees = 4
    density_grid_dim = 1
    k0_grid_dim = 12
    rgb_net_hidden_dim = 64
    particle_num_base = 11
    particle_dim = 16
    k = 8


TN = 256  # query tile size (rows per grid step); fills the 256-wide MXU


def _full_spec(shape):
    nd = len(shape)
    return pl.BlockSpec(shape, lambda i, _nd=nd: (0,) * _nd)


# ------------------------- kernel 1: particle MLP -------------------------- #
# Fully transposed: every matmul has the particle axis (lane-dense, Pp) as N.
# Emits [4, Pp]: rows 0..2 = deformed particle positions^T, row 3 = ||p||^2.
def particle_mlp_kernel(sigT_ref, w1T_ref, w2T_ref, w3T_ref, w4T_ref,
                        wtT_ref, xyz0T_ref, out_ref):
    h = jnp.maximum(jnp.dot(w1T_ref[...], sigT_ref[...],
                            preferred_element_type=jnp.float32), 0.0)
    h = jnp.maximum(jnp.dot(w2T_ref[...], h,
                            preferred_element_type=jnp.float32), 0.0)
    h = jnp.maximum(jnp.dot(w3T_ref[...], h,
                            preferred_element_type=jnp.float32), 0.0)
    pcodeT = jnp.dot(w4T_ref[...], h,
                     preferred_element_type=jnp.float32)          # [3T, Pp]
    posT = jnp.dot(wtT_ref[...], pcodeT,
                   preferred_element_type=jnp.float32) + xyz0T_ref[...]  # [3, Pp]
    psq = jnp.sum(posT * posT, axis=0, keepdims=True)             # [1, Pp]
    out_ref[...] = jnp.concatenate([posT, psq], axis=0)           # [4, Pp]


# ----------------- kernel 2+3 fused: knn-IDW + canonical DVGO --------------- #
def _sin_enc(v, degrees):
    # SinusoidalEncoder(x_dim, 0, degrees, use_identity=True, sin_only=False)
    if degrees == 0:
        return v
    parts = [v]
    parts += [jnp.sin(v * (2.0 ** i)) for i in range(degrees)]
    parts += [jnp.sin(v * (2.0 ** i) + 0.5 * math.pi) for i in range(degrees)]
    return jnp.concatenate(parts, axis=-1)


def fused_query_kernel(q_ref, vd_ref, pos_ref, grid_ref, s_ref,
                       w1_ref, b1_ref, w2_ref, b2_ref, w3_ref, b3_ref,
                       out_ref,
                       *, k, cutoff_sq, p_valid, base,
                       xyz_min, xyz_max, gx, gy, gz, n_chan,
                       view_deg, xyz_deg):
    q = q_ref[...]                                        # [tN, 3]
    tN = q.shape[0]

    # ---------------- knn (brute force) + inverse-distance weighting --------
    pos = pos_ref[...]                                    # [4, Pp]
    posT = pos[0:3, :]                                    # [3, Pp]
    psq = pos[3:4, :]                                     # [1, Pp]  (hoisted ||p||^2)
    Pp = posT.shape[-1]

    d2 = (jnp.sum(q * q, axis=-1, keepdims=True)
          - 2.0 * jnp.dot(q, posT, preferred_element_type=jnp.float32)
          + psq)                                          # [tN, Pp]
    d2 = jnp.maximum(d2, 0.0)
    iota = lax.broadcasted_iota(jnp.int32, (tN, Pp), 1).astype(jnp.float32)
    d2 = jnp.where(iota < float(p_valid), d2, jnp.float32(1e30))  # mask pad cols

    bf = float(base)
    bb = float(base * base)
    wsum_i = jnp.zeros((tN, 1), jnp.float32)
    wsum_j = jnp.zeros((tN, 1), jnp.float32)
    wsum_k = jnp.zeros((tN, 1), jnp.float32)
    den = jnp.zeros((tN, 1), jnp.float32)
    first_min = None
    for step in range(k):
        m = jnp.min(d2, axis=-1, keepdims=True)           # [tN, 1]
        if step == 0:
            first_min = m
        idx = jnp.min(jnp.where(d2 == m, iota, jnp.float32(Pp)),
                      axis=-1, keepdims=True)             # tie-break -> lowest idx
        # arithmetic decode of the regular linspace-meshgrid particle index
        i_f = jnp.floor((idx + 0.5) * (1.0 / bb))
        rem = idx - i_f * bb
        j_f = jnp.floor((rem + 0.5) * (1.0 / bf))
        k_f = rem - j_f * bf
        w = 1.0 / jnp.maximum(m, 1e-16)
        wsum_i += w * i_f
        wsum_j += w * j_f
        wsum_k += w * k_f
        den += w
        d2 = jnp.where(iota == idx, jnp.float32(1e30), d2)

    inv_den = 1.0 / den
    step_x = (xyz_max[0] - xyz_min[0]) / (bf - 1.0)
    step_y = (xyz_max[1] - xyz_min[1]) / (bf - 1.0)
    step_z = (xyz_max[2] - xyz_min[2]) / (bf - 1.0)
    yx = xyz_min[0] + step_x * (wsum_i * inv_den)
    yy = xyz_min[1] + step_y * (wsum_j * inv_den)
    yz = xyz_min[2] + step_z * (wsum_k * inv_den)
    y = jnp.concatenate([yx, yy, yz], axis=-1)            # [tN, 3]

    static = first_min > jnp.float32(cutoff_sq)           # nearest farther => static
    qc = jnp.where(static, q, y)                          # canonical query coords

    # ----------------- trilinear grid sample (separable) --------------------
    def axis_coord(col, lo, hi, g):
        u = (qc[:, col:col + 1] - lo) / (hi - lo)
        f = jnp.clip(u * float(g - 1), 0.0, float(g - 1))
        i0 = jnp.clip(jnp.floor(f), 0.0, float(g - 2))
        return i0, f - i0

    ix0, tx = axis_coord(0, xyz_min[0], xyz_max[0], gx)
    iy0, ty = axis_coord(1, xyz_min[1], xyz_max[1], gy)
    iz0, tz = axis_coord(2, xyz_min[2], xyz_max[2], gz)

    # (x, y) bilinear gather as ONE weighted-one-hot matmul: [tN,256]@[256,gz*C]
    iota_xy = lax.broadcasted_iota(jnp.int32, (tN, gx * gy), 1).astype(jnp.float32)
    b00 = ix0 * float(gy) + iy0
    wxy = ((1.0 - tx) * (1.0 - ty) * (iota_xy == b00).astype(jnp.float32)
           + (1.0 - tx) * ty * (iota_xy == b00 + 1.0).astype(jnp.float32)
           + tx * (1.0 - ty) * (iota_xy == b00 + float(gy)).astype(jnp.float32)
           + tx * ty * (iota_xy == b00 + float(gy) + 1.0).astype(jnp.float32))
    f1 = jnp.dot(wxy, grid_ref[...],
                 preferred_element_type=jnp.float32)      # [tN, gz*C]

    # z linear interp via a lane mask + tiny summing matmul [tN,gz*C]@[gz*C,C]
    lane = lax.broadcasted_iota(jnp.int32, (tN, gz * n_chan), 1).astype(jnp.float32)
    zid = jnp.floor((lane + 0.5) * (1.0 / float(n_chan)))
    wz = ((zid == iz0).astype(jnp.float32) * (1.0 - tz)
          + (zid == iz0 + 1.0).astype(jnp.float32) * tz)
    feat = jnp.dot(f1 * wz, s_ref[...],
                   preferred_element_type=jnp.float32)    # [tN, C]

    dfeat = feat[:, 0:1]
    cfeat = feat[:, 1:n_chan]
    # torch softplus (beta=1, threshold=20)
    density = jnp.where(dfeat > 20.0, dfeat,
                        jnp.log1p(jnp.exp(jnp.minimum(dfeat, 20.0))))

    # ----------------------------- rgb MLP ----------------------------------
    venc = _sin_enc(vd_ref[...], view_deg)
    xenc = _sin_enc(qc, xyz_deg)
    code = jnp.concatenate([cfeat, venc, xenc], axis=-1)

    h = jnp.maximum(jnp.dot(code, w1_ref[...],
                            preferred_element_type=jnp.float32) + b1_ref[...], 0.0)
    h = jnp.maximum(jnp.dot(h, w2_ref[...],
                            preferred_element_type=jnp.float32) + b2_ref[...], 0.0)
    o = jnp.dot(h, w3_ref[...], preferred_element_type=jnp.float32) + b3_ref[...]
    rgb = jax.nn.sigmoid(o)

    # merged narrow output: [rgb(3) | density(1) | static(1) | pad(3)]
    out_ref[...] = jnp.concatenate(
        [rgb, density, static.astype(jnp.float32),
         jnp.zeros((tN, 3), jnp.float32)], axis=-1)


# ------------------------------ glue / wrapper ------------------------------ #
def time_encode(t_mean, deg):
    t = t_mean.reshape(1, 1)
    scales = jnp.array([2.0 ** i for i in range(deg)], jnp.float32)
    xb = (t * scales).reshape(1, -1)                      # [1, deg]
    latent = jnp.sin(jnp.concatenate([xb, xb + math.pi], axis=-1))  # sin_only
    return jnp.concatenate([t, latent], axis=-1)          # [1, 1 + 2*deg]


def init_params(key, cfg):
    gx, gy, gz = cfg.canonical_grid_size_fine
    T = 1 + 2 * cfg.time_encoder_degrees
    vdim = 3 + 2 * cfg.view_encoder_degrees * 3
    xdim = 3 + 2 * cfg.xyz_encoder_degrees * 3
    din = cfg.k0_grid_dim + vdim + xdim
    rd = cfg.rgb_net_hidden_dim

    ks = jax.random.split(key, 12)
    n = lambda k, s, sc: (jax.random.normal(k, s, jnp.float32) * sc)

    xmin = jnp.array(cfg.scene_aabb[:3], jnp.float32)
    xmax = jnp.array(cfg.scene_aabb[3:], jnp.float32)
    b = cfg.particle_num_base
    lx = jnp.linspace(xmin[0], xmax[0], b)
    ly = jnp.linspace(xmin[1], xmax[1], b)
    lz = jnp.linspace(xmin[2], xmax[2], b)
    X, Y, Z = jnp.meshgrid(lx, ly, lz, indexing="ij")
    particle_xyz0 = jnp.stack([X.ravel(), Y.ravel(), Z.ravel()], axis=1)  # [P,3]

    params = dict(
        particle_xyz0=particle_xyz0,
        particle_signature=n(ks[0], (particle_xyz0.shape[0], cfg.particle_dim), 0.01),
        pnet_w1=n(ks[1], (cfg.particle_dim, 64), 1.0 / math.sqrt(cfg.particle_dim)),
        pnet_w2=n(ks[2], (64, 64), 1.0 / 8.0),
        pnet_w3=n(ks[3], (64, 64), 1.0 / 8.0),
        pnet_w4=n(ks[4], (64, 3 * T), 1.0 / 8.0),
        grid_density=n(ks[5], (cfg.density_grid_dim, gx, gy, gz), 1.0),
        grid_k0=n(ks[6], (cfg.k0_grid_dim, gx, gy, gz), 1.0),
        rgb_w1=n(ks[7], (din, rd), 1.0 / math.sqrt(din)),
        rgb_b1=jnp.zeros((1, rd), jnp.float32),
        rgb_w2=n(ks[8], (rd, rd), 1.0 / math.sqrt(rd)),
        rgb_b2=jnp.zeros((1, rd), jnp.float32),
        rgb_w3=n(ks[9], (rd, 3), 1.0 / math.sqrt(rd)),
        rgb_b3=jnp.zeros((1, 3), jnp.float32),
    )
    return params


def dnerf_particle_forward(params, x, t, view_dir, cfg):
    gx, gy, gz = cfg.canonical_grid_size_fine
    xyz_min = cfg.scene_aabb[:3]
    xyz_max = cfg.scene_aabb[3:]
    T = 1 + 2 * cfg.time_encoder_degrees
    k0 = cfg.k0_grid_dim
    C = cfg.density_grid_dim + k0
    base = cfg.particle_num_base

    xyz0 = params["particle_xyz0"]
    P = xyz0.shape[0]
    Pp = ((P + 127) // 128) * 128    # lane-padded particle count

    # --- time code & [3, 3T] contraction matrix (tiny scalar math, glue) ---
    time_code = time_encode(jnp.mean(t), cfg.time_encoder_degrees)     # [1, T]
    WtT = jnp.kron(jnp.eye(3, dtype=jnp.float32), time_code.reshape(1, T))  # [3, 3T]

    # --- kernel 1: deformed particle positions (transposed, lane-dense) ---
    sigT = jnp.zeros((cfg.particle_dim, Pp), jnp.float32).at[:, :P].set(
        params["particle_signature"].T)
    xyz0T = jnp.zeros((3, Pp), jnp.float32).at[:, :P].set(xyz0.T)
    w1T = params["pnet_w1"].T
    w2T = params["pnet_w2"].T
    w3T = params["pnet_w3"].T
    w4T = params["pnet_w4"].T

    pos_psq = pl.pallas_call(
        particle_mlp_kernel,
        out_shape=jax.ShapeDtypeStruct((4, Pp), jnp.float32),
        grid=(1,),
        in_specs=[_full_spec(a.shape) for a in
                  (sigT, w1T, w2T, w3T, w4T, WtT, xyz0T)],
        out_specs=_full_spec((4, Pp)),
        compiler_params=pltpu.CompilerParams(
            dimension_semantics=("arbitrary",)),
    )(sigT, w1T, w2T, w3T, w4T, WtT, xyz0T)

    # --- fused kernel 2+3: knn-IDW back to canonical coords + DVGO forward ---
    N = x.shape[0]
    Npad = ((N + TN - 1) // TN) * TN
    x_pad = jnp.zeros((Npad, 3), jnp.float32).at[:N].set(x)
    vd_pad = jnp.zeros((Npad, 3), jnp.float32).at[:N].set(view_dir)

    # grid slab: [gx*gy, gz*C] with Gxy[x*gy+y, z*C+c] = grid[c, x, y, z]
    grid_all = jnp.concatenate(
        [params["grid_density"], params["grid_k0"]], axis=0)          # [C,gx,gy,gz]
    grid_xy = jnp.transpose(grid_all, (1, 2, 3, 0)).reshape(gx * gy, gz * C)
    # z/channel summing matrix: S[z*C+c, c] = 1
    S = (jnp.arange(gz * C)[:, None] % C ==
         jnp.arange(C)[None, :]).astype(jnp.float32)                  # [gz*C, C]

    cut_off_th = float(max(xm - xn for xm, xn in zip(xyz_max, xyz_min))
                       / (base - 1.0))
    ntiles = Npad // TN

    out = pl.pallas_call(
        partial(fused_query_kernel, k=cfg.k, cutoff_sq=cut_off_th ** 2,
                p_valid=P, base=base, xyz_min=xyz_min, xyz_max=xyz_max,
                gx=gx, gy=gy, gz=gz, n_chan=C,
                view_deg=cfg.view_encoder_degrees,
                xyz_deg=cfg.xyz_encoder_degrees),
        out_shape=jax.ShapeDtypeStruct((Npad, 8), jnp.float32),
        grid=(ntiles,),
        in_specs=[pl.BlockSpec((TN, 3), lambda i: (i, 0)),
                  pl.BlockSpec((TN, 3), lambda i: (i, 0)),
                  _full_spec((4, Pp)),
                  _full_spec((gx * gy, gz * C)),
                  _full_spec((gz * C, C)),
                  _full_spec(params["rgb_w1"].shape),
                  _full_spec(params["rgb_b1"].shape),
                  _full_spec(params["rgb_w2"].shape),
                  _full_spec(params["rgb_b2"].shape),
                  _full_spec(params["rgb_w3"].shape),
                  _full_spec(params["rgb_b3"].shape)],
        out_specs=pl.BlockSpec((TN, 8), lambda i: (i, 0)),
        compiler_params=pltpu.CompilerParams(
            dimension_semantics=("parallel",),
            vmem_limit_bytes=32 * 1024 * 1024),
    )(x_pad, vd_pad, pos_psq, grid_xy, S,
      params["rgb_w1"], params["rgb_b1"],
      params["rgb_w2"], params["rgb_b2"],
      params["rgb_w3"], params["rgb_b3"])

    rgb = out[:N, 0:3]
    density = out[:N, 3:4]
    static = out[:N, 4]
    dynamic_rate = jnp.where(static.sum() > 0, 1.0 - static.mean(), 1.0)
    return rgb, density, dynamic_rate


# ----------------------------------- main ----------------------------------- #
if __name__ == "__main__":
    cfg = Config()
    params = init_params(jax.random.PRNGKey(0), cfg)

    N = 256
    kx, kv = jax.random.split(jax.random.PRNGKey(0), 2)
    x = jax.random.uniform(kx, (N, 3), jnp.float32, minval=-1.0, maxval=1.0)
    t = jnp.full((N, 1), 0.35, jnp.float32)              # all timestamps equal
    view_dir = jax.random.normal(kv, (N, 3), jnp.float32)
    view_dir = view_dir / jnp.linalg.norm(view_dir, axis=-1, keepdims=True)

    rgb, density, dyn_rate = dnerf_particle_forward(params, x, t, view_dir, cfg)
    jax.block_until_ready((rgb, density, dyn_rate))

    assert rgb.shape == (N, 3) and rgb.dtype == jnp.float32
    assert density.shape == (N, 1) and density.dtype == jnp.float32
    assert bool(jnp.all(jnp.isfinite(rgb))) and bool(jnp.all(jnp.isfinite(density)))
    assert bool(jnp.all((rgb >= 0.0) & (rgb <= 1.0)))
    assert bool(jnp.all(density >= 0.0))
    print("KERNEL_OK")
</pallas_src>

<mosaic_0001>
module attributes {stable_mosaic.version = 11 : i64} {
  func.func @particle_mlp_kernel(%arg0: i32, %arg1: memref<16x1408xf32, #tpu.memory_space<vmem>>, %arg2: memref<64x16xf32, #tpu.memory_space<vmem>>, %arg3: memref<64x64xf32, #tpu.memory_space<vmem>>, %arg4: memref<64x64xf32, #tpu.memory_space<vmem>>, %arg5: memref<27x64xf32, #tpu.memory_space<vmem>>, %arg6: memref<3x27xf32, #tpu.memory_space<vmem>>, %arg7: memref<3x1408xf32, #tpu.memory_space<vmem>>, %arg8: memref<4x1408xf32, #tpu.memory_space<vmem>>) attributes {dimension_semantics = [#tpu.dimension_semantics<arbitrary>], iteration_bounds = array<i64: 1>, scalar_prefetch = 0 : i64, scratch_operands = 0 : i64, tpu.core_type = #tpu.core_type<tc>, window_params = [{pipeline_mode = #tpu.pipeline_mode<synchronous>, transform_indices = @transform_0, window_bounds = array<i64: 16, 1408>}, {pipeline_mode = #tpu.pipeline_mode<synchronous>, transform_indices = @transform_1, window_bounds = array<i64: 64, 16>}, {pipeline_mode = #tpu.pipeline_mode<synchronous>, transform_indices = @transform_2, window_bounds = array<i64: 64, 64>}, {pipeline_mode = #tpu.pipeline_mode<synchronous>, transform_indices = @transform_3, window_bounds = array<i64: 64, 64>}, {pipeline_mode = #tpu.pipeline_mode<synchronous>, transform_indices = @transform_4, window_bounds = array<i64: 27, 64>}, {pipeline_mode = #tpu.pipeline_mode<synchronous>, transform_indices = @transform_5, window_bounds = array<i64: 3, 27>}, {pipeline_mode = #tpu.pipeline_mode<synchronous>, transform_indices = @transform_6, window_bounds = array<i64: 3, 1408>}, {pipeline_mode = #tpu.pipeline_mode<synchronous>, transform_indices = @transform_7, window_bounds = array<i64: 4, 1408>}]} {
    %c0 = arith.constant 0 : index
    %c0_0 = arith.constant 0 : index
    %0 = vector.load %arg2[%c0, %c0_0] : memref<64x16xf32, #tpu.memory_space<vmem>>, vector<64x16xf32>
    %c0_1 = arith.constant 0 : index
    %c0_2 = arith.constant 0 : index
    %1 = vector.load %arg1[%c0_1, %c0_2] : memref<16x1408xf32, #tpu.memory_space<vmem>>, vector<16x1408xf32>
    %cst = arith.constant dense<0.000000e+00> : vector<64x1408xf32>
    %2 = tpu.matmul %0, %1, %cst {dimension_numbers = #tpu.dot_dimension_numbers<[1], [0], [0], [1], [0, 0, 1, 1], [], []>} : vector<64x16xf32>, vector<16x1408xf32>, vector<64x1408xf32> -> vector<64x1408xf32>
    %cst_3 = arith.constant 0.000000e+00 : f32
    %3 = vector.broadcast %cst_3 : f32 to vector<64x1408xf32>
    %4 = arith.maximumf %2, %3 : vector<64x1408xf32>
    %c0_4 = arith.constant 0 : index
    %c0_5 = arith.constant 0 : index
    %5 = vector.load %arg3[%c0_4, %c0_5] : memref<64x64xf32, #tpu.memory_space<vmem>>, vector<64x64xf32>
    %cst_6 = arith.constant dense<0.000000e+00> : vector<64x1408xf32>
    %6 = tpu.matmul %5, %4, %cst_6 {dimension_numbers = #tpu.dot_dimension_numbers<[1], [0], [0], [1], [0, 0, 1, 1], [], []>} : vector<64x64xf32>, vector<64x1408xf32>, vector<64x1408xf32> -> vector<64x1408xf32>
    %cst_7 = arith.constant 0.000000e+00 : f32
    %7 = vector.broadcast %cst_7 : f32 to vector<64x1408xf32>
    %8 = arith.maximumf %6, %7 : vector<64x1408xf32>
    %c0_8 = arith.constant 0 : index
    %c0_9 = arith.constant 0 : index
    %9 = vector.load %arg4[%c0_8, %c0_9] : memref<64x64xf32, #tpu.memory_space<vmem>>, vector<64x64xf32>
    %cst_10 = arith.constant dense<0.000000e+00> : vector<64x1408xf32>
    %10 = tpu.matmul %9, %8, %cst_10 {dimension_numbers = #tpu.dot_dimension_numbers<[1], [0], [0], [1], [0, 0, 1, 1], [], []>} : vector<64x64xf32>, vector<64x1408xf32>, vector<64x1408xf32> -> vector<64x1408xf32>
    %cst_11 = arith.constant 0.000000e+00 : f32
    %11 = vector.broadcast %cst_11 : f32 to vector<64x1408xf32>
    %12 = arith.maximumf %10, %11 : vector<64x1408xf32>
    %c0_12 = arith.constant 0 : index
    %c0_13 = arith.constant 0 : index
    %13 = vector.load %arg5[%c0_12, %c0_13] : memref<27x64xf32, #tpu.memory_space<vmem>>, vector<27x64xf32>
    %cst_14 = arith.constant dense<0.000000e+00> : vector<27x1408xf32>
    %14 = tpu.matmul %13, %12, %cst_14 {dimension_numbers = #tpu.dot_dimension_numbers<[1], [0], [0], [1], [0, 0, 1, 1], [], []>} : vector<27x64xf32>, vector<64x1408xf32>, vector<27x1408xf32> -> vector<27x1408xf32>
    %c0_15 = arith.constant 0 : index
    %c0_16 = arith.constant 0 : index
    %15 = vector.load %arg6[%c0_15, %c0_16] : memref<3x27xf32, #tpu.memory_space<vmem>>, vector<3x27xf32>
    %cst_17 = arith.constant dense<0.000000e+00> : vector<3x1408xf32>
    %16 = tpu.matmul %15, %14, %cst_17 {dimension_numbers = #tpu.dot_dimension_numbers<[1], [0], [0], [1], [0, 0, 1, 1], [], []>} : vector<3x27xf32>, vector<27x1408xf32>, vector<3x1408xf32> -> vector<3x1408xf32>
    %c0_18 = arith.constant 0 : index
    %c0_19 = arith.constant 0 : index
    %17 = vector.load %arg7[%c0_18, %c0_19] : memref<3x1408xf32, #tpu.memory_space<vmem>>, vector<3x1408xf32>
    %18 = arith.addf %16, %17 : vector<3x1408xf32>
    %19 = arith.mulf %18, %18 : vector<3x1408xf32>
    %cst_20 = arith.constant dense<0.000000e+00> : vector<1408xf32>
    %20 = vector.multi_reduction <add>, %19, %cst_20 [0] : vector<3x1408xf32> to vector<1408xf32>
    %21 = vector.shape_cast %20 : vector<1408xf32> to vector<1x1408xf32>
    %22 = tpu.concatenate %18, %21 in 0 : vector<3x1408xf32>, vector<1x1408xf32> -> vector<4x1408xf32>
    %c0_21 = arith.constant 0 : index
    %c0_22 = arith.constant 0 : index
    %23 = vector.load %arg8[%c0_21, %c0_22] : memref<4x1408xf32, #tpu.memory_space<vmem>>, vector<4x1408xf32>
    tpu.vector_store %arg8[%c0_21, %c0_22], %22 {strides = array<i32>} : memref<4x1408xf32, #tpu.memory_space<vmem>>, vector<4x1408xf32>,
    return
  }
  func.func @transform_0(%arg0: i32) -> (i32, i32) {
    %c0_i32 = arith.constant 0 : i32
    %c0_i32_0 = arith.constant 0 : i32
    %c0_i32_1 = arith.constant 0 : i32
    return %c0_i32, %c0_i32_0 : i32, i32
  }
  func.func @transform_1(%arg0: i32) -> (i32, i32) {
    %c0_i32 = arith.constant 0 : i32
    %c0_i32_0 = arith.constant 0 : i32
    %c0_i32_1 = arith.constant 0 : i32
    return %c0_i32, %c0_i32_0 : i32, i32
  }
  func.func @transform_2(%arg0: i32) -> (i32, i32) {
    %c0_i32 = arith.constant 0 : i32
    %c0_i32_0 = arith.constant 0 : i32
    %c0_i32_1 = arith.constant 0 : i32
    return %c0_i32, %c0_i32_0 : i32, i32
  }
  func.func @transform_3(%arg0: i32) -> (i32, i32) {
    %c0_i32 = arith.constant 0 : i32
    %c0_i32_0 = arith.constant 0 : i32
    %c0_i32_1 = arith.constant 0 : i32
    return %c0_i32, %c0_i32_0 : i32, i32
  }
  func.func @transform_4(%arg0: i32) -> (i32, i32) {
    %c0_i32 = arith.constant 0 : i32
    %c0_i32_0 = arith.constant 0 : i32
    %c0_i32_1 = arith.constant 0 : i32
    return %c0_i32, %c0_i32_0 : i32, i32
  }
  func.func @transform_5(%arg0: i32) -> (i32, i32) {
    %c0_i32 = arith.constant 0 : i32
    %c0_i32_0 = arith.constant 0 : i32
    %c0_i32_1 = arith.constant 0 : i32
    return %c0_i32, %c0_i32_0 : i32, i32
  }
  func.func @transform_6(%arg0: i32) -> (i32, i32) {
    %c0_i32 = arith.constant 0 : i32
    %c0_i32_0 = arith.constant 0 : i32
    %c0_i32_1 = arith.constant 0 : i32
    return %c0_i32, %c0_i32_0 : i32, i32
  }
  func.func @transform_7(%arg0: i32) -> (i32, i32) {
    %c0_i32 = arith.constant 0 : i32
    %c0_i32_0 = arith.constant 0 : i32
    %c0_i32_1 = arith.constant 0 : i32
    return %c0_i32, %c0_i32_0 : i32, i32
  }
}

</mosaic_0001>

<bundles_post_ra>
// kernel: tpu_custom_call.1
= control target key start
LH: loop header
LB: loop body
LE: loop exit
PB: predicated region body
PF: predicated region fallthrough
CT: control target
= control target key end

     0   :  { %12 = vsyncpa [#allocation3], 0  ;;  %s5280_s0 = inlined_call_operand.hbm [shape: f32[16,1408], index: 0, kind: input, shape index: {}]   ;;  %s5281_s1 = inlined_call_operand.vmem [shape: f32[64,16], index: 1, kind: input, shape index: {}]   ;;  %s5282_s2 = inlined_call_operand.vmem [shape: f32[64,64], index: 2, kind: input, shape index: {}]   ;;  %s5283_s3 = inlined_call_operand.hbm [shape: f32[64,64], index: 3, kind: input, shape index: {}]   ;;  %s5284_s4 = inlined_call_operand.hbm [shape: f32[27,64], index: 4, kind: input, shape index: {}]   ;;  %s5285_s5 = inlined_call_operand.vmem [shape: f32[3,27], index: 5, kind: input, shape index: {}]   ;;  %s5286_s6 = inlined_call_operand.hbm [shape: f32[3,1408], index: 6, kind: input, shape index: {}]   ;;  %s5287_s7 = inlined_call_operand.hbm [shape: f32[4,1408], index: 7, kind: output, shape index: {}]  }
   0x1   :  { %13 = vsyncpa [#allocation6], 0 }
   0x2   :  { %14 = vsyncpa [#allocation9], 0 }
   0x3   :  { %15 = vsyncpa [#allocation4], 0  ;;  %s4503_s24 = smov [#allocation5]   ;;  %s4385_s28 = scalar_lea.hbm %s5283_s3, 1024 }
   0x4   :  { %s37_s25 = sshll.u32 %s4503_s24, 4  ;;  %p4386_p0 = scmp.ne.s32.totalorder %s5283_s3, %s4385_s28  ;;  %s38_s25 = int_to_ptr.vmem [resolvable:$true] %s37_s25 }
   0x5   :  { %p4389_p1 = scmp.lt.u32.totalorder %s4385_s28, %s5283_s3 }
   0x7   :  { %p4391_p2 = pnand %p4389_p1, %p4386_p0 }
   0x9   :  { %4394 = shalt.err (!%p4391_p2)
}
   0xa   :  { %s4395_s10 = scalar_lea.vmem %s38_s25, 1024  ;;  %p4400_p4 = scmp.lt.s32.totalorder %s38_s25, %s38_s25 }
   0xb   :  { %p4396_p3 = scmp.ne.s32.totalorder %s38_s25, %s4395_s10  ;;  %p4401_p5 = scmp.lt.s32.totalorder %s4395_s10, %s4395_s10 }
   0xd   :  { %p4402_p6 = por %p4401_p5, %p4400_p4 }
   0xf   :  { %p4403_p7 = pnand %p4402_p6, %p4396_p3 }
  0x11   :  { %4406 = shalt.err (!%p4403_p7)
}
  0x12   :  { %s4504_s11 = smov 128   ;;  %s4505_s12 = smov 8  }
  0x13   :  { %43 = dma.hbm_to_vmem [thread:$0]  %s5283_s3, 1024, %s38_s25, [#allocation6], %s4504_s11, %s4504_s11, %s4505_s12  }
  0x14   :  { %s4506_s15 = smov [#allocation2]   ;;  %s4407_s19 = scalar_lea.hbm %s5280_s0, 2816 }
  0x15   :  { %s21_s16 = sshll.u32 %s4506_s15, 4  ;;  %p4408_p8 = scmp.ne.s32.totalorder %s5280_s0, %s4407_s19  ;;  %s22_s16 = int_to_ptr.vmem [resolvable:$true] %s21_s16 }
  0x16   :  { %p4411_p9 = scmp.lt.u32.totalorder %s4407_s19, %s5280_s0 }
  0x18   :  { %p4413_p10 = pnand %p4411_p9, %p4408_p8 }
  0x1a   :  { %4416 = shalt.err (!%p4413_p10)
}
  0x1b   :  { %s4417_s24 = scalar_lea.vmem %s22_s16, 2816  ;;  %p4422_p12 = scmp.lt.s32.totalorder %s22_s16, %s22_s16 }
  0x1c   :  { %p4418_p11 = scmp.ne.s32.totalorder %s22_s16, %s4417_s24  ;;  %p4423_p13 = scmp.lt.s32.totalorder %s4417_s24, %s4417_s24 }
  0x1e   :  { %p4424_p0 = por %p4423_p13, %p4422_p12 }
  0x20   :  { %p4425_p1 = pnand %p4424_p0, %p4418_p11 }
  0x22   :  { %4428 = shalt.err (!%p4425_p1)
}
  0x23   :  { %s4507_s3 = smov 1408   ;;  %s4508_s25 = smov 88  }
  0x24   :  { %27 = dma.hbm_to_vmem [thread:$0]  %s5280_s0, 2816, %s22_s16, [#allocation3], %s4507_s3, %s4507_s3, %s4508_s25  }
  0x25   :  { %s4509_s28 = smov [#allocation7]   ;;  %s4510_s30 = smov [#allocation8]  }
  0x26   :  { %s49_s29 = sshll.u32 %s4509_s28, 4  ;;  %s64_s8 = sshll.u32 %s4510_s30, 4  ;;  %s50_s29 = int_to_ptr.vmem [resolvable:$true] %s49_s29  ;;  %s65_s8 = int_to_ptr.vmem [resolvable:$true] %s64_s8 }
  0x27   :  { %s4429_s13 = scalar_lea.hbm %s5284_s4, 512 }
  0x28   :  { %p4430_p2 = scmp.ne.s32.totalorder %s5284_s4, %s4429_s13  ;;  %p4433_p3 = scmp.lt.u32.totalorder %s4429_s13, %s5284_s4 }
  0x2a   :  { %p4435_p4 = pnand %p4433_p3, %p4430_p2 }
  0x2c   :  { %4438 = shalt.err (!%p4435_p4)
}
  0x2d   :  { %s4439_s0 = scalar_lea.vmem %s50_s29, 512  ;;  %p4444_p6 = scmp.lt.s32.totalorder %s50_s29, %s50_s29 }
  0x2e   :  { %p4440_p5 = scmp.ne.s32.totalorder %s50_s29, %s4439_s0  ;;  %p4445_p7 = scmp.lt.s32.totalorder %s4439_s0, %s4439_s0 }
  0x30   :  { %p4446_p8 = por %p4445_p7, %p4444_p6 }
  0x32   :  { %p4447_p9 = pnand %p4446_p8, %p4440_p5 }
  0x34   :  { %4450 = shalt.err (!%p4447_p9)
}
  0x35   :  { %55 = dma.hbm_to_vmem [thread:$0]  %s5284_s4, 512, %s50_s29, [#allocation6], %s4504_s11, %s4504_s11, %s4505_s12  }
  0x36   :  { %s4451_s22 = scalar_lea.hbm %s5286_s6, 704 }
  0x37   :  { %p4452_p10 = scmp.ne.s32.totalorder %s5286_s6, %s4451_s22  ;;  %p4455_p11 = scmp.lt.u32.totalorder %s4451_s22, %s5286_s6 }
  0x39   :  { %p4457_p12 = pnand %p4455_p11, %p4452_p10 }
  0x3b   :  { %4460 = shalt.err (!%p4457_p12)
}
  0x3c   :  { %s4461_s26 = scalar_lea.vmem %s65_s8, 704  ;;  %p4466_p0 = scmp.lt.s32.totalorder %s65_s8, %s65_s8 }
  0x3d   :  { %p4462_p13 = scmp.ne.s32.totalorder %s65_s8, %s4461_s26  ;;  %p4467_p1 = scmp.lt.s32.totalorder %s4461_s26, %s4461_s26 }
  0x3f   :  { %p4468_p2 = por %p4467_p1, %p4466_p0 }
  0x41   :  { %p4469_p3 = pnand %p4468_p2, %p4462_p13 }
  0x43   :  { %4472 = shalt.err (!%p4469_p3)
}
  0x44   :  { %67 = dma.hbm_to_vmem [thread:$0]  %s5286_s6, 704, %s65_s8, [#allocation9]  }
  0x45   :  { %4495 = dma.done.wait [#allocation3], 2816  }
  0x46   :  { %4496 = vsyncadd [#allocation3], 4294964480 }
  0x47   :  { %4497 = dma.done.wait [#allocation6], 1536  }
  0x48   :  { %4498 = vsyncadd [#allocation6], 4294965760 }
  0x49   :  { %4499 = dma.done.wait [#allocation9], 704  }
  0x4a   :  { %4500 = vsyncadd [#allocation9], 4294966592  ;;  %v4511_v0 = vmov 0.0   ;;  %v89_v1 = vld [vmem:[#allocation2 + $0x8] sm:$0xff]  ;;  %v100_v2 = vld [vmem:[#allocation2 + $0x60] sm:$0xff]  ;;  %vm110_vm0 = vcmask 130048  }
  0x4b   :  { %199 = vmatprep.mubr.f32.mxu0 %v4511_v0  ;;  %241 = vmatprep.mubr.f32.mxu1 %v4511_v0  ;;  %v88_v3 = vld [vmem:[#allocation2] sm:$0xff]  ;;  %v3996_v4 = vpack.c.bf16 %v100_v2, %v89_v1  ;;  %v99_v5 = vld [vmem:[#allocation2 + $0x58] sm:$0xff]  ;;  %v93_v7 = vld [vmem:[#allocation2 + $0x28] sm:$0xff]  ;;  %vm901_vm1 = vcmask 523264   ;;  %vm3046_vm2 = vcmask 1042432   ;;  %vm4512_vm3 = vmmov 1  }
  0x4c   :  { %v3998_v6 = vpack.c.bf16 %v99_v5, %v88_v3  ;;  %v104_v8 = vld [vmem:[#allocation2 + $0x80] sm:$0xff]  ;;  %v103_v12 = vld [vmem:[#allocation2 + $0x78] sm:$0xff]  ;;  %v102_v16 = vld [vmem:[#allocation2 + $0x70] sm:$0xff]  ;;  %vm3042_vm5 = vcmask 220160   ;;  %vm4514_vm6 = vmmov 0  }
  0x4d   :  { %v92_v9 = vld [vmem:[#allocation2 + $0x20] sm:$0xff]  ;;  %3997 = vmatprep.subr.bf16.mxu0 %v3996_v4  ;;  %v4004_v11 = vpack.c.bf16 %v104_v8, %v93_v7  ;;  %4365 = vmatprep.subr.bf16.mxu1 %v3996_v4  ;;  %v4620_v13 = vld [vmem:[%s5281_s1 + $0x38] sm:$0xff]  ;;  %v90_v17 = vld [vmem:[#allocation2 + $0x10] sm:$0xff] }
  0x4e   :  { %v4615_v10 = vld [vmem:[%s5281_s1] sm:$0xff]  ;;  %3999 = vmatpush1.bf16.msra.mxu0 %v3998_v6  ;;  %v4006_v14 = vpack.c.bf16 %v103_v12, %v92_v9  ;;  %4366 = vmatpush1.bf16.msra.mxu1 %v3998_v6  ;;  %v91_v15 = vld [vmem:[#allocation2 + $0x18] sm:$0xff]  ;;  %v101_v19 = vld [vmem:[#allocation2 + $0x68] sm:$0xff] }
  0x4f   :  { %4005 = vmatprep.subr.bf16.mxu0 %v4004_v11  ;;  %v4000_v18 = vpack.c.bf16 %v102_v16, %v91_v15  ;;  %v4002_v20 = vpack.c.bf16 %v101_v19, %v90_v17  ;;  %v95_v21 = vld [vmem:[#allocation2 + $0x38] sm:$0xff]  ;;  %v106_v22 = vld [vmem:[#allocation2 + $0x90] sm:$0xff]  ;;  %v105_v24 = vld [vmem:[#allocation2 + $0x88] sm:$0xff] }
  0x50   :  { %v94_v23 = vld [vmem:[#allocation2 + $0x30] sm:$0xff]  ;;  %v4630_v25 = vld [vmem:[%s5281_s1 + $0x8] sm:$0xff]  ;;  %v4008_v26 = vpack.c.bf16 %v106_v22, %v95_v21  ;;  %v108_v28 = vld [vmem:[#allocation2 + $0xa0] sm:$0xff] }
  0x51   :  { %3647 = vmatmul.mubr.msk.f32.vlgmr.msra.gmra.mrb[0].mxu0 %vm110_vm0, %v4615_v10  ;;  %3654 = vmatmul.mubr.msk.f32.vlgmr.msra.gmra.mrb[0].mxu1 %vm110_vm0, %v4620_v13  ;;  %v97_v27 = vld [vmem:[#allocation2 + $0x48] sm:$0xff]  ;;  %v98_v30 = vld [vmem:[#allocation2 + $0x50] sm:$0xff]  ;;  %v4010_v32 = vpack.c.bf16 %v105_v24, %v94_v23  ;;  %v4650_v35 = vld [vmem:[%s5281_s1 + $0x18] sm:$0xff] }
  0x52   :  { %205 = vmatprep.mubr.f32.mxu0 %v4511_v0  ;;  %4007 = vmatpush1.bf16.msra.mxu0 %v4006_v14  ;;  %v4012_v29 = vpack.c.bf16 %v108_v28, %v97_v27  ;;  %v109_v31 = vld [vmem:[#allocation2 + $0xa8] sm:$0xff]  ;;  %v4639_v34 = vld [vmem:[%s5281_s1 + $0x10] sm:$0xff]  ;;  %v4661_v36 = vld [vmem:[%s5281_s1 + $0x20] sm:$0xff] }
  0x53   :  { %4001 = vmatprep.subr.bf16.mxu1 %v4000_v18  ;;  %312 = vmatprep.mubr.f32.mxu1 %v4511_v0  ;;  %v4016_v33 = vpack.c.bf16 %v109_v31, %v98_v30  ;;  %v4672_v37 = vld [vmem:[%s5281_s1 + $0x28] sm:$0xff]  ;;  %v4683_v38 = vld [vmem:[%s5281_s1 + $0x30] sm:$0xff]  ;;  %v96_v39 = vld [vmem:[#allocation2 + $0x40] sm:$0xff] }
  0x54   :  { %4003 = vmatpush1.bf16.msra.mxu1 %v4002_v20  ;;  %4013 = vmatprep.subr.bf16.mxu0 %v4012_v29  ;;  %v107_v40 = vld [vmem:[#allocation2 + $0x98] sm:$0xff]  ;;  %vm5199_vm4 = vmpackc.low %vm3046_vm2, %vm4512_vm3 }
  0x55   :  { %3648 = vmatmul.mubr.msk.f32.gmra.mrb[2].mxu0 %vm110_vm0, %v4630_v25  ;;  %4009 = vmatprep.subr.bf16.mxu1 %v4008_v26  ;;  %v4014_v41 = vpack.c.bf16 %v107_v40, %v96_v39 }
  0x56   :  { %211 = vmatprep.mubr.f32.mxu0 %v4511_v0 }
  0x57   :  { %3655 = vmatmul.mubr.msk.f32.vlgmr.msra.gmra.mrb[2].mxu1 %vm110_vm0, %v4615_v10 }
  0x58   :  { %318 = vmatprep.mubr.f32.mxu1 %v4511_v0  ;;  %4011 = vmatpush1.bf16.msra.mxu1 %v4010_v32 }
  0x59   :  { %3649 = vmatmul.mubr.msk.f32.gmra.mrb[4].mxu0 %vm110_vm0, %v4639_v34  ;;  %4017 = vmatprep.subr.bf16.mxu1 %v4016_v33 }
  0x5a   :  { %217 = vmatprep.mubr.f32.mxu0 %v4511_v0 }
  0x5b   :  { %3656 = vmatmul.mubr.msk.f32.gmra.mrb[4].mxu1 %vm110_vm0, %v4630_v25 }
  0x5c   :  { %324 = vmatprep.mubr.f32.mxu1 %v4511_v0 }
  0x5d   :  { %3650 = vmatmul.mubr.msk.f32.gmra.mrb[6].mxu0 %vm110_vm0, %v4650_v35 }
  0x5e   :  { %223 = vmatprep.mubr.f32.mxu0 %v4511_v0 }
  0x5f   :  { %3657 = vmatmul.mubr.msk.f32.gmra.mrb[6].mxu1 %vm110_vm0, %v4639_v34 }
  0x60   :  { %330 = vmatprep.mubr.f32.mxu1 %v4511_v0 }
  0x61   :  { %3651 = vmatmul.mubr.msk.f32.gmra.mrb[8].mxu0 %vm110_vm0, %v4661_v36 }
  0x62   :  { %229 = vmatprep.mubr.f32.mxu0 %v4511_v0 }
  0x63   :  { %3658 = vmatmul.mubr.msk.f32.gmra.mrb[8].mxu1 %vm110_vm0, %v4650_v35 }
  0x64   :  { %336 = vmatprep.mubr.f32.mxu1 %v4511_v0 }
  0x65   :  { %3652 = vmatmul.mubr.msk.f32.gmra.mrb[10].mxu0 %vm110_vm0, %v4672_v37 }
  0x66   :  { %235 = vmatprep.mubr.f32.mxu0 %v4511_v0 }
  0x67   :  { %3659 = vmatmul.mubr.msk.f32.gmra.mrb[10].mxu1 %vm110_vm0, %v4661_v36 }
  0x68   :  { %342 = vmatprep.mubr.f32.mxu1 %v4511_v0 }
  0x69   :  { %3653 = vmatmul.mubr.msk.f32.gmra.mrb[12].mxu0 %vm110_vm0, %v4683_v38 }
  0x6a   :  { %425 = vmatprep.mubr.f32.mxu0 %v4511_v0 }
  0x6b   :  { %3660 = vmatmul.mubr.msk.f32.gmra.mrb[12].mxu1 %vm110_vm0, %v4672_v37 }
  0x6c   :  { %348 = vmatprep.mubr.f32.mxu1 %v4511_v0 }
  0x6d   :  { %3663 = vmatmul.mubr.msk.f32.vlgmr.msra.gmra.mrb[14].mxu0 %vm110_vm0, %v4615_v10 }
  0x6e   :  { %431 = vmatprep.mubr.f32.mxu0 %v4511_v0  ;;  %4015 = vmatpush1.bf16.msra.mxu0 %v4014_v41 }
  0x6f   :  { %3661 = vmatmul.mubr.msk.f32.gmra.mrb[14].mxu1 %vm110_vm0, %v4683_v38 }
  0x70   :  { %354 = vmatprep.mubr.f32.mxu1 %v4511_v0 }
  0x71   :  { %3664 = vmatmul.mubr.msk.f32.gmra.mrb[16].mxu0 %vm110_vm0, %v4630_v25 }
  0x72   :  { %437 = vmatprep.mubr.f32.mxu0 %v4511_v0 }
  0x73   :  { %3662 = vmatmul.mubr.msk.f32.gmra.mrb[16].mxu1 %vm110_vm0, %v4620_v13 }
  0x74   :  { %538 = vmatprep.mubr.f32.mxu1 %v4511_v0 }
  0x75   :  { %3665 = vmatmul.mubr.msk.f32.gmra.mrb[18].mxu0 %vm110_vm0, %v4639_v34 }
  0x76   :  { %443 = vmatprep.mubr.f32.mxu0 %v4511_v0 }
  0x77   :  { %3671 = vmatmul.mubr.msk.f32.vlgmr.msra.gmra.mrb[18].mxu1 %vm110_vm0, %v4615_v10 }
  0x78   :  { %544 = vmatprep.mubr.f32.mxu1 %v4511_v0  ;;  %4019 = vmatpush3.bf16.msra.mxu1 %v4016_v33 }
  0x79   :  { %3666 = vmatmul.mubr.msk.f32.gmra.mrb[20].mxu0 %vm110_vm0, %v4650_v35 }
  0x7a   :  { %449 = vmatprep.mubr.f32.mxu0 %v4511_v0 }
  0x7b   :  { %3672 = vmatmul.mubr.msk.f32.gmra.mrb[20].mxu1 %vm110_vm0, %v4630_v25 }
  0x7c   :  { %550 = vmatprep.mubr.f32.mxu1 %v4511_v0 }
  0x7d   :  { %3667 = vmatmul.mubr.msk.f32.gmra.mrb[22].mxu0 %vm110_vm0, %v4661_v36 }
  0x7e   :  { %455 = vmatprep.mubr.f32.mxu0 %v4511_v0 }
  0x7f   :  { %3673 = vmatmul.mubr.msk.f32.gmra.mrb[22].mxu1 %vm110_vm0, %v4639_v34 }
  0x80   :  { %556 = vmatprep.mubr.f32.mxu1 %v4511_v0 }
  0x81   :  { %3668 = vmatmul.mubr.msk.f32.gmra.mrb[24].mxu0 %vm110_vm0, %v4672_v37 }
  0x82   :  { %461 = vmatprep.mubr.f32.mxu0 %v4511_v0 }
  0x83   :  { %3674 = vmatmul.mubr.msk.f32.gmra.mrb[24].mxu1 %vm110_vm0, %v4650_v35 }
  0x84   :  { %562 = vmatprep.mubr.f32.mxu1 %v4511_v0 }
  0x85   :  { %3669 = vmatmul.mubr.msk.f32.gmra.mrb[26].mxu0 %vm110_vm0, %v4683_v38 }
  0x86   :  { %467 = vmatprep.mubr.f32.mxu0 %v4511_v0 }
  0x87   :  { %3675 = vmatmul.mubr.msk.f32.gmra.mrb[26].mxu1 %vm110_vm0, %v4661_v36 }
  0x88   :  { %568 = vmatprep.mubr.f32.mxu1 %v4511_v0 }
  0x89   :  { %3670 = vmatmul.mubr.msk.f32.gmra.mrb[28].mxu0 %vm110_vm0, %v4620_v13 }
  0x8a   :  { %651 = vmatprep.mubr.f32.mxu0 %v4511_v0 }
  0x8b   :  { %3676 = vmatmul.mubr.msk.f32.gmra.mrb[28].mxu1 %vm110_vm0, %v4672_v37 }
  0x8c   :  { %574 = vmatprep.mubr.f32.mxu1 %v4511_v0 }
  0x8d   :  { %3679 = vmatmul.mubr.msk.f32.vlgmr.msra.gmra.mrb[30].mxu0 %vm110_vm0, %v4615_v10 }
  0x8e   :  { %657 = vmatprep.mubr.f32.mxu0 %v4511_v0 }
  0x8f   :  { %3677 = vmatmul.mubr.msk.f32.gmra.mrb[30].mxu1 %vm110_vm0, %v4683_v38 }
  0x90   :  { %580 = vmatprep.mubr.f32.mxu1 %v4511_v0 }
  0x91   :  { %3680 = vmatmul.mubr.msk.f32.gmra.mrb[32].mxu0 %vm110_vm0, %v4630_v25 }
  0x92   :  { %663 = vmatprep.mubr.f32.mxu0 %v4511_v0 }
  0x93   :  { %3678 = vmatmul.mubr.msk.f32.gmra.mrb[32].mxu1 %vm110_vm0, %v4620_v13 }
  0x94   :  { %3895 = vmatprep.mubr.msk.f32.mxu1 %vm110_vm0, %v4615_v10 }
  0x95   :  { %3681 = vmatmul.mubr.msk.f32.gmra.mrb[34].mxu0 %vm110_vm0, %v4639_v34 }
  0x96   :  { %669 = vmatprep.mubr.f32.mxu0 %v4511_v0 }
  0x97   :  { %3896 = vmatmul.mubr.msk.f32.vlgmr.msra.gmra.mrb[34].mxu1 %vm110_vm0, %v4630_v25 }
  0x98   :  { %3898 = vmatprep.mubr.msk.f32.mxu1 %vm110_vm0, %v4639_v34 }
  0x99   :  { %3682 = vmatmul.mubr.msk.f32.gmra.mrb[36].mxu0 %vm110_vm0, %v4650_v35 }
  0x9a   :  { %675 = vmatprep.mubr.f32.mxu0 %v4511_v0 }
  0x9b   :  { %3899 = vmatmul.mubr.msk.f32.gmra.mrb[36].mxu1 %vm110_vm0, %v4650_v35 }
  0x9c   :  { %3901 = vmatprep.mubr.msk.f32.mxu1 %vm110_vm0, %v4661_v36 }
  0x9d   :  { %3683 = vmatmul.mubr.msk.f32.gmra.mrb[38].mxu0 %vm110_vm0, %v4661_v36 }
  0x9e   :  { %681 = vmatprep.mubr.f32.mxu0 %v4511_v0 }
  0x9f   :  { %3902 = vmatmul.mubr.msk.f32.gmra.mrb[38].mxu1 %vm110_vm0, %v4672_v37 }
  0xa0   :  { %3904 = vmatprep.mubr.msk.f32.mxu1 %vm110_vm0, %v4683_v38 }
  0xa1   :  { %3684 = vmatmul.mubr.msk.f32.gmra.mrb[40].mxu0 %vm110_vm0, %v4672_v37 }
  0xa2   :  { %687 = vmatprep.mubr.f32.mxu0 %v4511_v0 }
  0xa3   :  { %3905 = vmatmul.mubr.msk.f32.gmra.mrb[40].mxu1 %vm110_vm0, %v4620_v13 }
  0xa4   :  { %990 = vmatprep.mubr.f32.mxu1 %v4511_v0 }
  0xa5   :  { %3685 = vmatmul.mubr.msk.f32.gmra.mrb[42].mxu0 %vm110_vm0, %v4683_v38 }
  0xa6   :  { %693 = vmatprep.mubr.f32.mxu0 %v4511_v0 }
  0xa9   :  { %3686 = vmatmul.mubr.msk.f32.gmra.mrb[44].mxu0 %vm110_vm0, %v4620_v13 }
  0xaa   :  { %1103 = vmatprep.mubr.f32.mxu0 %v4511_v0 }
 0x124   :  { %v201_v42 = vpop.f32.mrb[0].mxu0  ;;  %v4788_v43 = vpop.f32.mrb[0].mxu1 }
 0x125   :  { %v203_v44 = vpop.f32.mrb[1].mxu0  ;;  %v4790_v45 = vpop.f32.mrb[1].mxu1  ;;  %v805_v47 = vmax.f32 %v201_v42, 0.0  ;;  %v882_v34 = vmax.f32 %v4788_v43, 0.0 }
 0x126   :  { %v806_v50 = vmax.f32 %v203_v44, 0.0  ;;  %v883_v38 = vmax.f32 %v4790_v45, 0.0  ;;  %v4797_v45 = vld [vmem:[%s5282_s2] sm:$0xff] }
 0x128   :  { %v207_v46 = vpop.f32.mrb[2].mxu0 }
 0x129   :  { %v816_v48 = vmax.f32 %v207_v46, 0.0  ;;  %v209_v49 = vpop.f32.mrb[3].mxu0 }
 0x12a   :  { %v817_v51 = vmax.f32 %v209_v49, 0.0  ;;  %v314_v52 = vpop.f32.mrb[2].mxu1 }
 0x12b   :  { %v4022_v53 = vpack.c.bf16 %v816_v48, %v805_v47  ;;  %v316_v54 = vpop.f32.mrb[3].mxu1  ;;  %v807_v58 = vmax.f32 %v314_v52, 0.0 }
 0x12c   :  { %v4020_v55 = vpack.c.bf16 %v817_v51, %v806_v50  ;;  %v213_v56 = vpop.f32.mrb[4].mxu0  ;;  %v808_v59 = vmax.f32 %v316_v54, 0.0 }
 0x12d   :  { %v215_v57 = vpop.f32.mrb[5].mxu0  ;;  %v827_v2 = vmax.f32 %v213_v56, 0.0 }
 0x12e   :  { %4021 = vmatprep.subr.bf16.mxu1 %v4020_v55  ;;  %v320_v60 = vpop.f32.mrb[4].mxu1  ;;  %v828_v6 = vmax.f32 %v215_v57, 0.0 }
 0x12f   :  { %4023 = vmatpush1.bf16.msra.mxu1 %v4022_v53  ;;  %v818_v61 = vmax.f32 %v320_v60, 0.0  ;;  %v322_v62 = vpop.f32.mrb[5].mxu1 }
 0x130   :  { %v219_v63 = vpop.f32.mrb[6].mxu0  ;;  %v819_v1 = vmax.f32 %v322_v62, 0.0 }
 0x131   :  { %v838_v3 = vmax.f32 %v219_v63, 0.0  ;;  %v221_v4 = vpop.f32.mrb[7].mxu0  ;;  %v4038_v5 = vpack.c.bf16 %v818_v61, %v807_v58 }
 0x132   :  { %v839_v7 = vmax.f32 %v221_v4, 0.0  ;;  %v4036_v8 = vpack.c.bf16 %v819_v1, %v808_v59  ;;  %v326_v9 = vpop.f32.mrb[6].mxu1  ;;  %v4805_v1 = vld [vmem:[%s5282_s2 + $0x8] sm:$0xff] }
 0x133   :  { %v4026_v10 = vpack.c.bf16 %v838_v3, %v827_v2  ;;  %v328_v11 = vpop.f32.mrb[7].mxu1  ;;  %v829_v15 = vmax.f32 %v326_v9, 0.0 }
 0x134   :  { %v4024_v12 = vpack.c.bf16 %v839_v7, %v828_v6  ;;  %v225_v13 = vpop.f32.mrb[8].mxu0  ;;  %4037 = vmatprep.subr.bf16.mxu0 %v4036_v8  ;;  %v830_v16 = vmax.f32 %v328_v11, 0.0  ;;  %v4813_v11 = vld [vmem:[%s5282_s2 + $0x10] sm:$0xff] }
 0x135   :  { %v227_v14 = vpop.f32.mrb[9].mxu0  ;;  %4039 = vmatpush1.bf16.msra.mxu0 %v4038_v5  ;;  %v849_v22 = vmax.f32 %v225_v13, 0.0 }
 0x136   :  { %4025 = vmatprep.subr.bf16.mxu1 %v4024_v12  ;;  %v332_v17 = vpop.f32.mrb[8].mxu1  ;;  %v850_v26 = vmax.f32 %v227_v14, 0.0 }
 0x137   :  { %4027 = vmatpush1.bf16.msra.mxu1 %v4026_v10  ;;  %v840_v18 = vmax.f32 %v332_v17, 0.0  ;;  %v334_v19 = vpop.f32.mrb[9].mxu1 }
 0x138   :  { %v231_v20 = vpop.f32.mrb[10].mxu0  ;;  %v841_v21 = vmax.f32 %v334_v19, 0.0 }
 0x139   :  { %v860_v23 = vmax.f32 %v231_v20, 0.0  ;;  %v233_v24 = vpop.f32.mrb[11].mxu0  ;;  %v4042_v25 = vpack.c.bf16 %v840_v18, %v829_v15 }
 0x13a   :  { %v861_v27 = vmax.f32 %v233_v24, 0.0  ;;  %v4040_v28 = vpack.c.bf16 %v841_v21, %v830_v16  ;;  %v338_v29 = vpop.f32.mrb[10].mxu1 }
 0x13b   :  { %v4030_v30 = vpack.c.bf16 %v860_v23, %v849_v22  ;;  %v340_v31 = vpop.f32.mrb[11].mxu1  ;;  %v851_v37 = vmax.f32 %v338_v29, 0.0  ;;  %v4821_v23 = vld [vmem:[%s5282_s2 + $0x18] sm:$0xff] }
 0x13c   :  { %v4028_v32 = vpack.c.bf16 %v861_v27, %v850_v26  ;;  %v237_v33 = vpop.f32.mrb[12].mxu0  ;;  %4041 = vmatprep.subr.bf16.mxu0 %v4040_v28  ;;  %v852_v40 = vmax.f32 %v340_v31, 0.0 }
 0x13d   :  { %v871_v35 = vmax.f32 %v237_v33, 0.0  ;;  %v239_v36 = vpop.f32.mrb[13].mxu0  ;;  %4043 = vmatpush1.bf16.msra.mxu0 %v4042_v25  ;;  %v4832_v33 = vld [vmem:[%s5282_s2 + $0x20] sm:$0xff] }
 0x13e   :  { %v872_v39 = vmax.f32 %v239_v36, 0.0  ;;  %4029 = vmatprep.subr.bf16.mxu1 %v4028_v32  ;;  %v344_v41 = vpop.f32.mrb[12].mxu1 }
 0x13f   :  { %v4034_v42 = vpack.c.bf16 %v882_v34, %v871_v35  ;;  %4031 = vmatpush1.bf16.msra.mxu1 %v4030_v30  ;;  %v862_v44 = vmax.f32 %v344_v41, 0.0  ;;  %v346_v46 = vpop.f32.mrb[13].mxu1 }
 0x140   :  { %v4032_v47 = vpack.c.bf16 %v883_v38, %v872_v39  ;;  %v427_v48 = vpop.f32.mrb[14].mxu0  ;;  %v863_v49 = vmax.f32 %v346_v46, 0.0 }
 0x141   :  { %v429_v50 = vpop.f32.mrb[15].mxu0  ;;  %v4046_v51 = vpack.c.bf16 %v862_v44, %v851_v37  ;;  %v809_v55 = vmax.f32 %v427_v48, 0.0 }
 0x142   :  { %4033 = vmatprep.subr.bf16.mxu1 %v4032_v47  ;;  %v4044_v43 = vpack.c.bf16 %v863_v49, %v852_v40  ;;  %v350_v52 = vpop.f32.mrb[14].mxu1  ;;  %v810_v59 = vmax.f32 %v429_v50, 0.0  ;;  %v4843_v47 = vld [vmem:[%s5282_s2 + $0x28] sm:$0xff] }
 0x143   :  { %4035 = vmatpush1.bf16.msra.mxu1 %v4034_v42  ;;  %v352_v53 = vpop.f32.mrb[15].mxu1  ;;  %v873_v58 = vmax.f32 %v350_v52, 0.0 }
 0x144   :  { %v433_v54 = vpop.f32.mrb[16].mxu0  ;;  %4045 = vmatprep.subr.bf16.mxu0 %v4044_v43  ;;  %v874_v61 = vmax.f32 %v352_v53, 0.0 }
 0x145   :  { %v820_v56 = vmax.f32 %v433_v54, 0.0  ;;  %v435_v57 = vpop.f32.mrb[17].mxu0  ;;  %4047 = vmatpush1.bf16.msra.mxu0 %v4046_v51 }
 0x146   :  { %v821_v60 = vmax.f32 %v435_v57, 0.0  ;;  %3695 = vmatmul.mubr.msk.f32.vlgmr.msra.gmra.mrb[42].mxu1 %vm901_vm1, %v4797_v45  ;;  %v356_v62 = vpop.f32.mrb[16].mxu1 }
 0x147   :  { %v4054_v63 = vpack.c.bf16 %v820_v56, %v809_v55  ;;  %996 = vmatprep.mubr.f32.mxu1 %v4511_v0  ;;  %v884_v2 = vmax.f32 %v356_v62, 0.0  ;;  %v358_v3 = vpop.f32.mrb[17].mxu1  ;;  %v4854_v56 = vld [vmem:[%s5282_s2 + $0x30] sm:$0xff] }
 0x148   :  { %v4052_v4 = vpack.c.bf16 %v821_v60, %v810_v59  ;;  %v439_v5 = vpop.f32.mrb[18].mxu0  ;;  %v885_v6 = vmax.f32 %v358_v3, 0.0 }
 0x149   :  { %v441_v7 = vpop.f32.mrb[19].mxu0  ;;  %v4050_v8 = vpack.c.bf16 %v884_v2, %v873_v58  ;;  %v831_v14 = vmax.f32 %v439_v5, 0.0 }
 0x14a   :  { %3696 = vmatmul.mubr.msk.f32.gmra.mrb[44].mxu1 %vm901_vm1, %v4805_v1  ;;  %4053 = vmatprep.subr.bf16.mxu1 %v4052_v4  ;;  %v4048_v9 = vpack.c.bf16 %v885_v6, %v874_v61  ;;  %v540_v10 = vpop.f32.mrb[18].mxu1  ;;  %v832_v18 = vmax.f32 %v441_v7, 0.0  ;;  %v4865_v6 = vld [vmem:[%s5282_s2 + $0x38] sm:$0xff] }
 0x14b   :  { %4055 = vmatpush1.bf16.msra.mxu1 %v4054_v63  ;;  %1002 = vmatprep.mubr.f32.mxu1 %v4511_v0  ;;  %v542_v12 = vpop.f32.mrb[19].mxu1  ;;  %v811_v17 = vmax.f32 %v540_v10, 0.0 }
 0x14c   :  { %v445_v13 = vpop.f32.mrb[20].mxu0  ;;  %4049 = vmatprep.subr.bf16.mxu0 %v4048_v9  ;;  %v812_v20 = vmax.f32 %v542_v12, 0.0 }
 0x14d   :  { %v842_v15 = vmax.f32 %v445_v13, 0.0  ;;  %v447_v16 = vpop.f32.mrb[21].mxu0  ;;  %4051 = vmatpush1.bf16.msra.mxu0 %v4050_v8 }
 0x14e   :  { %v843_v19 = vmax.f32 %v447_v16, 0.0  ;;  %3697 = vmatmul.mubr.msk.f32.gmra.mrb[46].mxu1 %vm901_vm1, %v4813_v11  ;;  %v546_v21 = vpop.f32.mrb[20].mxu1 }
 0x14f   :  { %v4058_v22 = vpack.c.bf16 %v842_v15, %v831_v14  ;;  %1008 = vmatprep.mubr.f32.mxu1 %v4511_v0  ;;  %v822_v24 = vmax.f32 %v546_v21, 0.0  ;;  %v548_v25 = vpop.f32.mrb[21].mxu1 }
 0x150   :  { %v4056_v26 = vpack.c.bf16 %v843_v19, %v832_v18  ;;  %v451_v27 = vpop.f32.mrb[22].mxu0  ;;  %3703 = vmatmul.mubr.msk.f32.vlgmr.msra.gmra.mrb[46].mxu0 %vm901_vm1, %v4797_v45  ;;  %v823_v28 = vmax.f32 %v548_v25, 0.0 }
 0x151   :  { %v453_v29 = vpop.f32.mrb[23].mxu0  ;;  %v4070_v30 = vpack.c.bf16 %v822_v24, %v811_v17  ;;  %1109 = vmatprep.mubr.f32.mxu0 %v4511_v0  ;;  %v853_v36 = vmax.f32 %v451_v27, 0.0 }
 0x152   :  { %3698 = vmatmul.mubr.msk.f32.gmra.mrb[48].mxu1 %vm901_vm1, %v4821_v23  ;;  %4057 = vmatprep.subr.bf16.mxu1 %v4056_v26  ;;  %v4068_v31 = vpack.c.bf16 %v823_v28, %v812_v20  ;;  %v552_v32 = vpop.f32.mrb[22].mxu1  ;;  %v854_v40 = vmax.f32 %v453_v29, 0.0 }
 0x153   :  { %4059 = vmatpush1.bf16.msra.mxu1 %v4058_v22  ;;  %1014 = vmatprep.mubr.f32.mxu1 %v4511_v0  ;;  %v554_v34 = vpop.f32.mrb[23].mxu1  ;;  %v833_v39 = vmax.f32 %v552_v32, 0.0 }
 0x154   :  { %v457_v35 = vpop.f32.mrb[24].mxu0  ;;  %3704 = vmatmul.mubr.msk.f32.gmra.mrb[48].mxu0 %vm901_vm1, %v4805_v1  ;;  %4069 = vmatprep.subr.bf16.mxu0 %v4068_v31  ;;  %v834_v42 = vmax.f32 %v554_v34, 0.0 }
 0x155   :  { %v864_v37 = vmax.f32 %v457_v35, 0.0  ;;  %v459_v38 = vpop.f32.mrb[25].mxu0  ;;  %1115 = vmatprep.mubr.f32.mxu0 %v4511_v0  ;;  %4071 = vmatpush1.bf16.msra.mxu0 %v4070_v30 }
 0x156   :  { %v865_v41 = vmax.f32 %v459_v38, 0.0  ;;  %3699 = vmatmul.mubr.msk.f32.gmra.mrb[50].mxu1 %vm901_vm1, %v4832_v33  ;;  %v558_v44 = vpop.f32.mrb[24].mxu1 }
 0x157   :  { %v4062_v46 = vpack.c.bf16 %v864_v37, %v853_v36  ;;  %1020 = vmatprep.mubr.f32.mxu1 %v4511_v0  ;;  %v844_v48 = vmax.f32 %v558_v44, 0.0  ;;  %v560_v49 = vpop.f32.mrb[25].mxu1 }
 0x158   :  { %v4060_v50 = vpack.c.bf16 %v865_v41, %v854_v40  ;;  %v463_v51 = vpop.f32.mrb[26].mxu0  ;;  %3705 = vmatmul.mubr.msk.f32.gmra.mrb[50].mxu0 %vm901_vm1, %v4813_v11  ;;  %v845_v43 = vmax.f32 %v560_v49, 0.0 }
 0x159   :  { %v465_v52 = vpop.f32.mrb[27].mxu0  ;;  %v4074_v53 = vpack.c.bf16 %v844_v48, %v833_v39  ;;  %1121 = vmatprep.mubr.f32.mxu0 %v4511_v0  ;;  %v875_v59 = vmax.f32 %v463_v51, 0.0 }
 0x15a   :  { %3700 = vmatmul.mubr.msk.f32.gmra.mrb[52].mxu1 %vm901_vm1, %v4843_v47  ;;  %4061 = vmatprep.subr.bf16.mxu1 %v4060_v50  ;;  %v4072_v54 = vpack.c.bf16 %v845_v43, %v834_v42  ;;  %v564_v55 = vpop.f32.mrb[26].mxu1  ;;  %v876_v63 = vmax.f32 %v465_v52, 0.0 }
 0x15b   :  { %4063 = vmatpush1.bf16.msra.mxu1 %v4062_v46  ;;  %1026 = vmatprep.mubr.f32.mxu1 %v4511_v0  ;;  %v566_v57 = vpop.f32.mrb[27].mxu1  ;;  %v855_v62 = vmax.f32 %v564_v55, 0.0 }
 0x15c   :  { %v469_v58 = vpop.f32.mrb[28].mxu0  ;;  %3706 = vmatmul.mubr.msk.f32.gmra.mrb[52].mxu0 %vm901_vm1, %v4821_v23  ;;  %4073 = vmatprep.subr.bf16.mxu0 %v4072_v54  ;;  %v856_v3 = vmax.f32 %v566_v57, 0.0 }
 0x15d   :  { %v886_v60 = vmax.f32 %v469_v58, 0.0  ;;  %v471_v61 = vpop.f32.mrb[29].mxu0  ;;  %1127 = vmatprep.mubr.f32.mxu0 %v4511_v0  ;;  %4075 = vmatpush1.bf16.msra.mxu0 %v4074_v53 }
 0x15e   :  { %v887_v2 = vmax.f32 %v471_v61, 0.0  ;;  %3701 = vmatmul.mubr.msk.f32.gmra.mrb[54].mxu1 %vm901_vm1, %v4854_v56  ;;  %v570_v4 = vpop.f32.mrb[28].mxu1 }
 0x15f   :  { %v4066_v5 = vpack.c.bf16 %v886_v60, %v875_v59  ;;  %1032 = vmatprep.mubr.f32.mxu1 %v4511_v0  ;;  %v866_v7 = vmax.f32 %v570_v4, 0.0  ;;  %v572_v8 = vpop.f32.mrb[29].mxu1 }
 0x160   :  { %v4064_v9 = vpack.c.bf16 %v887_v2, %v876_v63  ;;  %v653_v10 = vpop.f32.mrb[30].mxu0  ;;  %3707 = vmatmul.mubr.msk.f32.gmra.mrb[54].mxu0 %vm901_vm1, %v4832_v33  ;;  %v867_v12 = vmax.f32 %v572_v8, 0.0 }
 0x161   :  { %v655_v13 = vpop.f32.mrb[31].mxu0  ;;  %v4078_v14 = vpack.c.bf16 %v866_v7, %v855_v62  ;;  %1133 = vmatprep.mubr.f32.mxu0 %v4511_v0  ;;  %v813_v19 = vmax.f32 %v653_v10, 0.0 }
 0x162   :  { %3702 = vmatmul.mubr.msk.f32.gmra.mrb[56].mxu1 %vm901_vm1, %v4865_v6  ;;  %4065 = vmatprep.subr.bf16.mxu1 %v4064_v9  ;;  %v4076_v15 = vpack.c.bf16 %v867_v12, %v856_v3  ;;  %v576_v16 = vpop.f32.mrb[30].mxu1  ;;  %v814_v24 = vmax.f32 %v655_v13, 0.0 }
 0x163   :  { %4067 = vmatpush1.bf16.msra.mxu1 %v4066_v5  ;;  %1216 = vmatprep.mubr.f32.mxu1 %v4511_v0  ;;  %v578_v17 = vpop.f32.mrb[31].mxu1  ;;  %v877_v22 = vmax.f32 %v576_v16, 0.0 }
 0x164   :  { %v659_v18 = vpop.f32.mrb[32].mxu0  ;;  %3708 = vmatmul.mubr.msk.f32.gmra.mrb[56].mxu0 %vm901_vm1, %v4843_v47  ;;  %4077 = vmatprep.subr.bf16.mxu0 %v4076_v15  ;;  %v878_v26 = vmax.f32 %v578_v17, 0.0 }
 0x165   :  { %v824_v20 = vmax.f32 %v659_v18, 0.0  ;;  %v661_v21 = vpop.f32.mrb[33].mxu0  ;;  %1139 = vmatprep.mubr.f32.mxu0 %v4511_v0  ;;  %4079 = vmatpush1.bf16.msra.mxu0 %v4078_v14 }
 0x166   :  { %v825_v25 = vmax.f32 %v661_v21, 0.0  ;;  %3711 = vmatmul.mubr.msk.f32.vlgmr.msra.gmra.mrb[58].mxu1 %vm901_vm1, %v4797_v45  ;;  %v582_v27 = vpop.f32.mrb[32].mxu1 }
 0x167   :  { %v4086_v28 = vpack.c.bf16 %v824_v20, %v813_v19  ;;  %1222 = vmatprep.mubr.f32.mxu1 %v4511_v0  ;;  %v888_v29 = vmax.f32 %v582_v27, 0.0  ;;  %v584_v30 = vpop.f32.mrb[33].mxu1 }
 0x168   :  { %v4084_v31 = vpack.c.bf16 %v825_v25, %v814_v24  ;;  %v665_v32 = vpop.f32.mrb[34].mxu0  ;;  %v889_v34 = vmax.f32 %v584_v30, 0.0  ;;  %3709 = vmatmul.mubr.msk.f32.gmra.mrb[58].mxu0 %vm901_vm1, %v4854_v56 }
 0x169   :  { %v667_v35 = vpop.f32.mrb[35].mxu0  ;;  %v4082_v36 = vpack.c.bf16 %v888_v29, %v877_v22  ;;  %1145 = vmatprep.mubr.f32.mxu0 %v4511_v0  ;;  %v835_v44 = vmax.f32 %v665_v32, 0.0 }
 0x16a   :  { %3712 = vmatmul.mubr.msk.f32.gmra.mrb[60].mxu1 %vm901_vm1, %v4805_v1  ;;  %4085 = vmatprep.subr.bf16.mxu1 %v4084_v31  ;;  %v4080_v37 = vpack.c.bf16 %v889_v34, %v878_v26  ;;  %v3897_v38 = vpop.f32.mrb[34].mxu1  ;;  %v836_v49 = vmax.f32 %v667_v35, 0.0 }
 0x16b   :  { %4087 = vmatpush1.bf16.msra.mxu1 %v4086_v28  ;;  %1228 = vmatprep.mubr.f32.mxu1 %v4511_v0  ;;  %v826_v39 = vmax.f32 %v3897_v38, 0.0  ;;  %v766_v40 = vpop.f32.mrb[35].mxu1 }
 0x16c   :  { %v671_v41 = vpop.f32.mrb[36].mxu0  ;;  %3710 = vmatmul.mubr.msk.f32.gmra.mrb[60].mxu0 %vm901_vm1, %v4865_v6  ;;  %4081 = vmatprep.subr.bf16.mxu0 %v4080_v37  ;;  %v815_v42 = vmax.f32 %v766_v40, 0.0 }
 0x16d   :  { %v846_v46 = vmax.f32 %v671_v41, 0.0  ;;  %v673_v48 = vpop.f32.mrb[37].mxu0  ;;  %4083 = vmatpush1.bf16.msra.mxu0 %v4082_v36  ;;  %1329 = vmatprep.mubr.f32.mxu0 %v4511_v0 }
 0x16e   :  { %v847_v50 = vmax.f32 %v673_v48, 0.0  ;;  %3713 = vmatmul.mubr.msk.f32.gmra.mrb[62].mxu1 %vm901_vm1, %v4813_v11  ;;  %v4100_v51 = vpack.c.bf16 %v826_v39, %v815_v42  ;;  %v3900_v43 = vpop.f32.mrb[36].mxu1 }
 0x16f   :  { %v4090_v52 = vpack.c.bf16 %v846_v46, %v835_v44  ;;  %1234 = vmatprep.mubr.f32.mxu1 %v4511_v0  ;;  %v848_v53 = vmax.f32 %v3900_v43, 0.0  ;;  %v776_v54 = vpop.f32.mrb[37].mxu1 }
 0x170   :  { %v4088_v55 = vpack.c.bf16 %v847_v50, %v836_v49  ;;  %v677_v57 = vpop.f32.mrb[38].mxu0  ;;  %3719 = vmatmul.mubr.msk.f32.vlgmr.msra.gmra.mrb[62].mxu0 %vm901_vm1, %v4797_v45  ;;  %v837_v58 = vmax.f32 %v776_v54, 0.0  ;;  %4101 = vmatprep.subr.bf16.mxu0 %v4100_v51 }
 0x171   :  { %v679_v59 = vpop.f32.mrb[39].mxu0  ;;  %1335 = vmatprep.mubr.f32.mxu0 %v4511_v0  ;;  %4103 = vmatpush3.bf16.msra.mxu0 %v4100_v51  ;;  %v857_v4 = vmax.f32 %v677_v57, 0.0 }
 0x172   :  { %3714 = vmatmul.mubr.msk.f32.gmra.mrb[64].mxu1 %vm901_vm1, %v4821_v23  ;;  %4089 = vmatprep.subr.bf16.mxu1 %v4088_v55  ;;  %v4104_v60 = vpack.c.bf16 %v848_v53, %v837_v58  ;;  %v3903_v61 = vpop.f32.mrb[38].mxu1  ;;  %v858_v8 = vmax.f32 %v679_v59, 0.0 }
 0x173   :  { %4091 = vmatpush1.bf16.msra.mxu1 %v4090_v52  ;;  %1240 = vmatprep.mubr.f32.mxu1 %v4511_v0  ;;  %v870_v62 = vmax.f32 %v3903_v61, 0.0  ;;  %v786_v63 = vpop.f32.mrb[39].mxu1 }
 0x174   :  { %v683_v2 = vpop.f32.mrb[40].mxu0  ;;  %3720 = vmatmul.mubr.msk.f32.gmra.mrb[64].mxu0 %vm901_vm1, %v4805_v1  ;;  %v859_v3 = vmax.f32 %v786_v63, 0.0  ;;  %4105 = vmatprep.subr.bf16.mxu0 %v4104_v60 }
 0x175   :  { %v868_v5 = vmax.f32 %v683_v2, 0.0  ;;  %v685_v7 = vpop.f32.mrb[41].mxu0  ;;  %1341 = vmatprep.mubr.f32.mxu0 %v4511_v0  ;;  %4107 = vmatpush3.bf16.msra.mxu0 %v4104_v60 }
 0x176   :  { %v869_v9 = vmax.f32 %v685_v7, 0.0  ;;  %3715 = vmatmul.mubr.msk.f32.gmra.mrb[66].mxu1 %vm901_vm1, %v4832_v33  ;;  %v4108_v10 = vpack.c.bf16 %v870_v62, %v859_v3  ;;  %v3906_v12 = vpop.f32.mrb[40].mxu1 }
 0x177   :  { %v4094_v13 = vpack.c.bf16 %v868_v5, %v857_v4  ;;  %1246 = vmatprep.mubr.f32.mxu1 %v4511_v0  ;;  %v892_v14 = vmax.f32 %v3906_v12, 0.0  ;;  %v796_v15 = vpop.f32.mrb[41].mxu1 }
 0x178   :  { %v4092_v16 = vpack.c.bf16 %v869_v9, %v858_v8  ;;  %v689_v17 = vpop.f32.mrb[42].mxu0  ;;  %3721 = vmatmul.mubr.msk.f32.gmra.mrb[66].mxu0 %vm901_vm1, %v4813_v11  ;;  %v881_v18 = vmax.f32 %v796_v15, 0.0  ;;  %4109 = vmatprep.subr.bf16.mxu0 %v4108_v10 }
 0x179   :  { %v691_v19 = vpop.f32.mrb[43].mxu0  ;;  %1347 = vmatprep.mubr.f32.mxu0 %v4511_v0  ;;  %4111 = vmatpush3.bf16.msra.mxu0 %v4108_v10  ;;  %v879_v22 = vmax.f32 %v689_v17, 0.0 }
 0x17a   :  { %3716 = vmatmul.mubr.msk.f32.gmra.mrb[68].mxu1 %vm901_vm1, %v4843_v47  ;;  %4093 = vmatprep.subr.bf16.mxu1 %v4092_v16  ;;  %v4112_v20 = vpack.c.bf16 %v892_v14, %v881_v18  ;;  %v880_v26 = vmax.f32 %v691_v19, 0.0 }
 0x17b   :  { %4095 = vmatpush1.bf16.msra.mxu1 %v4094_v13  ;;  %1252 = vmatprep.mubr.f32.mxu1 %v4511_v0 }
 0x17c   :  { %v695_v21 = vpop.f32.mrb[44].mxu0  ;;  %3722 = vmatmul.mubr.msk.f32.gmra.mrb[68].mxu0 %vm901_vm1, %v4821_v23  ;;  %4113 = vmatprep.subr.bf16.mxu0 %v4112_v20 }
 0x17d   :  { %v890_v24 = vmax.f32 %v695_v21, 0.0  ;;  %v697_v25 = vpop.f32.mrb[45].mxu0  ;;  %1353 = vmatprep.mubr.f32.mxu0 %v4511_v0  ;;  %4115 = vmatpush3.bf16.msra.mxu0 %v4112_v20 }
 0x17e   :  { %v891_v27 = vmax.f32 %v697_v25, 0.0  ;;  %3717 = vmatmul.mubr.msk.f32.gmra.mrb[70].mxu1 %vm901_vm1, %v4854_v56 }
 0x17f   :  { %v4098_v28 = vpack.c.bf16 %v890_v24, %v879_v22  ;;  %1258 = vmatprep.mubr.f32.mxu1 %v4511_v0 }
 0x180   :  { %v4096_v29 = vpack.c.bf16 %v891_v27, %v880_v26  ;;  %3723 = vmatmul.mubr.msk.f32.gmra.mrb[70].mxu0 %vm901_vm1, %v4832_v33 }
 0x181   :  { %1359 = vmatprep.mubr.f32.mxu0 %v4511_v0 }
 0x182   :  { %3718 = vmatmul.mubr.msk.f32.gmra.mrb[72].mxu1 %vm901_vm1, %v4865_v6  ;;  %4097 = vmatprep.subr.bf16.mxu1 %v4096_v29 }
 0x183   :  { %4099 = vmatpush1.bf16.msra.mxu1 %v4098_v28  ;;  %1442 = vmatprep.mubr.f32.mxu1 %v4511_v0 }
 0x184   :  { %3724 = vmatmul.mubr.msk.f32.gmra.mrb[72].mxu0 %vm901_vm1, %v4843_v47 }
 0x185   :  { %1365 = vmatprep.mubr.f32.mxu0 %v4511_v0 }
 0x186   :  { %3727 = vmatmul.mubr.msk.f32.vlgmr.msra.gmra.mrb[74].mxu1 %vm901_vm1, %v4797_v45 }
 0x187   :  { %1448 = vmatprep.mubr.f32.mxu1 %v4511_v0 }
 0x188   :  { %3725 = vmatmul.mubr.msk.f32.gmra.mrb[74].mxu0 %vm901_vm1, %v4854_v56 }
 0x189   :  { %1371 = vmatprep.mubr.f32.mxu0 %v4511_v0 }
 0x18a   :  { %3728 = vmatmul.mubr.msk.f32.gmra.mrb[76].mxu1 %vm901_vm1, %v4805_v1 }
 0x18b   :  { %1454 = vmatprep.mubr.f32.mxu1 %v4511_v0 }
 0x18c   :  { %3726 = vmatmul.mubr.msk.f32.gmra.mrb[76].mxu0 %vm901_vm1, %v4865_v6 }
 0x18d   :  { %3923 = vmatprep.mubr.msk.f32.mxu0 %vm901_vm1, %v4797_v45 }
 0x18e   :  { %3729 = vmatmul.mubr.msk.f32.gmra.mrb[78].mxu1 %vm901_vm1, %v4813_v11 }
 0x18f   :  { %1460 = vmatprep.mubr.f32.mxu1 %v4511_v0 }
 0x190   :  { %3924 = vmatmul.mubr.msk.f32.vlgmr.msra.gmra.mrb[78].mxu0 %vm901_vm1, %v4805_v1 }
 0x191   :  { %3926 = vmatprep.mubr.msk.f32.mxu0 %vm901_vm1, %v4813_v11 }
 0x192   :  { %3730 = vmatmul.mubr.msk.f32.gmra.mrb[80].mxu1 %vm901_vm1, %v4821_v23 }
 0x193   :  { %1466 = vmatprep.mubr.f32.mxu1 %v4511_v0 }
 0x194   :  { %3927 = vmatmul.mubr.msk.f32.gmra.mrb[80].mxu0 %vm901_vm1, %v4821_v23 }
 0x195   :  { %3929 = vmatprep.mubr.msk.f32.mxu0 %vm901_vm1, %v4832_v33 }
 0x196   :  { %3731 = vmatmul.mubr.msk.f32.gmra.mrb[82].mxu1 %vm901_vm1, %v4832_v33 }
 0x197   :  { %1472 = vmatprep.mubr.f32.mxu1 %v4511_v0 }
 0x198   :  { %3930 = vmatmul.mubr.msk.f32.gmra.mrb[82].mxu0 %vm901_vm1, %v4843_v47 }
 0x199   :  { %3932 = vmatprep.mubr.msk.f32.mxu0 %vm901_vm1, %v4854_v56 }
 0x19a   :  { %3732 = vmatmul.mubr.msk.f32.gmra.mrb[84].mxu1 %vm901_vm1, %v4843_v47 }
 0x19b   :  { %1478 = vmatprep.mubr.f32.mxu1 %v4511_v0 }
 0x19c   :  { %3933 = vmatmul.mubr.msk.f32.gmra.mrb[84].mxu0 %vm901_vm1, %v4865_v6 }
 0x19d   :  { %1780 = vmatprep.mubr.f32.mxu0 %v4511_v0 }
 0x19e   :  { %3733 = vmatmul.mubr.msk.f32.gmra.mrb[86].mxu1 %vm901_vm1, %v4854_v56 }
 0x19f   :  { %1484 = vmatprep.mubr.f32.mxu1 %v4511_v0 }
 0x1a2   :  { %3734 = vmatmul.mubr.msk.f32.gmra.mrb[88].mxu1 %vm901_vm1, %v4865_v6 }
 0x1a3   :  { %1893 = vmatprep.mubr.f32.mxu1 %v4511_v0 }
 0x219   :  { %v992_v45 = vpop.f32.mrb[42].mxu1 }
 0x21a   :  { %v994_v1 = vpop.f32.mrb[43].mxu1  ;;  %v1596_v23 = vmax.f32 %v992_v45, 0.0 }
 0x21b   :  { %v1597_v30 = vmax.f32 %v994_v1, 0.0 }
 0x21d   :  { %v998_v11 = vpop.f32.mrb[44].mxu1 }
 0x21e   :  { %v1607_v33 = vmax.f32 %v998_v11, 0.0  ;;  %v1000_v47 = vpop.f32.mrb[45].mxu1 }
 0x21f   :  { %v1608_v31 = vmax.f32 %v1000_v47, 0.0 }
 0x220   :  { %v4118_v32 = vpack.c.bf16 %v1607_v33, %v1596_v23 }
 0x221   :  { %v4116_v34 = vpack.c.bf16 %v1608_v31, %v1597_v30  ;;  %v1004_v35 = vpop.f32.mrb[46].mxu1 }
 0x222   :  { %v1006_v36 = vpop.f32.mrb[47].mxu1  ;;  %v1618_v6 = vmax.f32 %v1004_v35, 0.0  ;;  %v4970_v35 = vld [vmem:[#allocation5] sm:$0xff] }
 0x223   :  { %4117 = vmatprep.subr.bf16.mxu0 %v4116_v34  ;;  %v1105_v56 = vpop.f32.mrb[46].mxu0  ;;  %v1619_v42 = vmax.f32 %v1006_v36, 0.0 }
 0x224   :  { %4119 = vmatpush1.bf16.msra.mxu0 %v4118_v32  ;;  %v1107_v37 = vpop.f32.mrb[47].mxu0  ;;  %v1598_v41 = vmax.f32 %v1105_v56, 0.0 }
 0x225   :  { %v1010_v38 = vpop.f32.mrb[48].mxu1  ;;  %v1599_v46 = vmax.f32 %v1107_v37, 0.0 }
 0x226   :  { %v1629_v39 = vmax.f32 %v1010_v38, 0.0  ;;  %v1012_v40 = vpop.f32.mrb[49].mxu1 }
 0x227   :  { %v1630_v44 = vmax.f32 %v1012_v40, 0.0  ;;  %v1111_v48 = vpop.f32.mrb[48].mxu0 }
 0x228   :  { %v4122_v49 = vpack.c.bf16 %v1629_v39, %v1618_v6  ;;  %v1609_v50 = vmax.f32 %v1111_v48, 0.0  ;;  %v1113_v51 = vpop.f32.mrb[49].mxu0  ;;  %v4975_v48 = vld [vmem:[#allocation5 + $0x8] sm:$0xff] }
 0x229   :  { %v4120_v43 = vpack.c.bf16 %v1630_v44, %v1619_v42  ;;  %v1016_v52 = vpop.f32.mrb[50].mxu1  ;;  %v1610_v53 = vmax.f32 %v1113_v51, 0.0 }
 0x22a   :  { %v1018_v54 = vpop.f32.mrb[51].mxu1  ;;  %v4134_v55 = vpack.c.bf16 %v1609_v50, %v1598_v41  ;;  %v1640_v61 = vmax.f32 %v1016_v52, 0.0 }
 0x22b   :  { %4121 = vmatprep.subr.bf16.mxu0 %v4120_v43  ;;  %v4132_v57 = vpack.c.bf16 %v1610_v53, %v1599_v46  ;;  %v1117_v58 = vpop.f32.mrb[50].mxu0  ;;  %v1641_v3 = vmax.f32 %v1018_v54, 0.0 }
 0x22c   :  { %4123 = vmatpush1.bf16.msra.mxu0 %v4122_v49  ;;  %v1119_v59 = vpop.f32.mrb[51].mxu0  ;;  %v1620_v2 = vmax.f32 %v1117_v58, 0.0  ;;  %v4980_v58 = vld [vmem:[#allocation5 + $0x10] sm:$0xff] }
 0x22d   :  { %v1022_v60 = vpop.f32.mrb[52].mxu1  ;;  %4133 = vmatprep.subr.bf16.mxu1 %v4132_v57  ;;  %v1621_v5 = vmax.f32 %v1119_v59, 0.0 }
 0x22e   :  { %v1651_v62 = vmax.f32 %v1022_v60, 0.0  ;;  %v1024_v63 = vpop.f32.mrb[53].mxu1  ;;  %4135 = vmatpush1.bf16.msra.mxu1 %v4134_v55 }
 0x22f   :  { %v1652_v4 = vmax.f32 %v1024_v63, 0.0  ;;  %v1123_v7 = vpop.f32.mrb[52].mxu0 }
 0x230   :  { %v4126_v8 = vpack.c.bf16 %v1651_v62, %v1640_v61  ;;  %v1631_v9 = vmax.f32 %v1123_v7, 0.0  ;;  %v1125_v10 = vpop.f32.mrb[53].mxu0 }
 0x231   :  { %v4124_v12 = vpack.c.bf16 %v1652_v4, %v1641_v3  ;;  %v1028_v13 = vpop.f32.mrb[54].mxu1  ;;  %v1632_v14 = vmax.f32 %v1125_v10, 0.0 }
 0x232   :  { %v1030_v15 = vpop.f32.mrb[55].mxu1  ;;  %v4138_v16 = vpack.c.bf16 %v1631_v9, %v1620_v2  ;;  %v1662_v21 = vmax.f32 %v1028_v13, 0.0  ;;  %v4985_v9 = vld [vmem:[#allocation5 + $0x18] sm:$0xff] }
 0x233   :  { %4125 = vmatprep.subr.bf16.mxu0 %v4124_v12  ;;  %v4136_v17 = vpack.c.bf16 %v1632_v14, %v1621_v5  ;;  %v1129_v18 = vpop.f32.mrb[54].mxu0  ;;  %v1663_v26 = vmax.f32 %v1030_v15, 0.0 }
 0x234   :  { %4127 = vmatpush1.bf16.msra.mxu0 %v4126_v8  ;;  %v1131_v19 = vpop.f32.mrb[55].mxu0  ;;  %v1642_v25 = vmax.f32 %v1129_v18, 0.0 }
 0x235   :  { %v1034_v20 = vpop.f32.mrb[56].mxu1  ;;  %4137 = vmatprep.subr.bf16.mxu1 %v4136_v17  ;;  %v1643_v28 = vmax.f32 %v1131_v19, 0.0 }
 0x236   :  { %v1673_v22 = vmax.f32 %v1034_v20, 0.0  ;;  %v1036_v24 = vpop.f32.mrb[57].mxu1  ;;  %4139 = vmatpush1.bf16.msra.mxu1 %v4138_v16  ;;  %v4993_v20 = vld [vmem:[#allocation5 + $0x20] sm:$0xff] }
 0x237   :  { %v1674_v27 = vmax.f32 %v1036_v24, 0.0  ;;  %v1135_v29 = vpop.f32.mrb[56].mxu0 }
 0x238   :  { %v4130_v45 = vpack.c.bf16 %v1673_v22, %v1662_v21  ;;  %v1653_v1 = vmax.f32 %v1135_v29, 0.0  ;;  %v1137_v11 = vpop.f32.mrb[57].mxu0 }
 0x239   :  { %v4128_v23 = vpack.c.bf16 %v1674_v27, %v1663_v26  ;;  %v1218_v33 = vpop.f32.mrb[58].mxu1  ;;  %v1654_v47 = vmax.f32 %v1137_v11, 0.0 }
 0x23a   :  { %v1220_v30 = vpop.f32.mrb[59].mxu1  ;;  %v4142_v31 = vpack.c.bf16 %v1653_v1, %v1642_v25  ;;  %v1600_v37 = vmax.f32 %v1218_v33, 0.0 }
 0x23b   :  { %4129 = vmatprep.subr.bf16.mxu0 %v4128_v23  ;;  %v4140_v32 = vpack.c.bf16 %v1654_v47, %v1643_v28  ;;  %v1141_v34 = vpop.f32.mrb[58].mxu0  ;;  %v1601_v40 = vmax.f32 %v1220_v30, 0.0  ;;  %v5001_v23 = vld [vmem:[#allocation5 + $0x28] sm:$0xff] }
 0x23c   :  { %4131 = vmatpush1.bf16.msra.mxu0 %v4130_v45  ;;  %v1143_v36 = vpop.f32.mrb[59].mxu0  ;;  %v1664_v39 = vmax.f32 %v1141_v34, 0.0 }
 0x23d   :  { %v1224_v56 = vpop.f32.mrb[60].mxu1  ;;  %4141 = vmatprep.subr.bf16.mxu1 %v4140_v32  ;;  %v1665_v42 = vmax.f32 %v1143_v36, 0.0 }
 0x23e   :  { %v1611_v38 = vmax.f32 %v1224_v56, 0.0  ;;  %v1226_v6 = vpop.f32.mrb[61].mxu1  ;;  %4143 = vmatpush1.bf16.msra.mxu1 %v4142_v31 }
 0x23f   :  { %v1612_v41 = vmax.f32 %v1226_v6, 0.0  ;;  %3743 = vmatmul.mubr.msk.f32.vlgmr.msra.gmra.mrb[86].mxu0 %vm901_vm1, %v4970_v35  ;;  %v1147_v44 = vpop.f32.mrb[60].mxu0 }
 0x240   :  { %v4150_v46 = vpack.c.bf16 %v1611_v38, %v1600_v37  ;;  %1786 = vmatprep.mubr.f32.mxu0 %v4511_v0  ;;  %v1675_v49 = vmax.f32 %v1147_v44, 0.0  ;;  %v1149_v50 = vpop.f32.mrb[61].mxu0  ;;  %v5009_v38 = vld [vmem:[#allocation5 + $0x30] sm:$0xff] }
 0x241   :  { %v4148_v51 = vpack.c.bf16 %v1612_v41, %v1601_v40  ;;  %v1230_v43 = vpop.f32.mrb[62].mxu1  ;;  %v1676_v52 = vmax.f32 %v1149_v50, 0.0 }
 0x242   :  { %v1232_v53 = vpop.f32.mrb[63].mxu1  ;;  %v4146_v54 = vpack.c.bf16 %v1675_v49, %v1664_v39  ;;  %v1622_v61 = vmax.f32 %v1230_v43, 0.0 }
 0x243   :  { %3744 = vmatmul.mubr.msk.f32.gmra.mrb[88].mxu0 %vm901_vm1, %v4975_v48  ;;  %4149 = vmatprep.subr.bf16.mxu0 %v4148_v51  ;;  %v4144_v55 = vpack.c.bf16 %v1676_v52, %v1665_v42  ;;  %v1331_v57 = vpop.f32.mrb[62].mxu0  ;;  %v1623_v3 = vmax.f32 %v1232_v53, 0.0  ;;  %v5017_v52 = vld [vmem:[#allocation5 + $0x38] sm:$0xff] }
 0x244   :  { %4151 = vmatpush1.bf16.msra.mxu0 %v4150_v46  ;;  %1792 = vmatprep.mubr.f32.mxu0 %v4511_v0  ;;  %v1333_v59 = vpop.f32.mrb[63].mxu0  ;;  %v1602_v2 = vmax.f32 %v1331_v57, 0.0 }
 0x245   :  { %v1236_v60 = vpop.f32.mrb[64].mxu1  ;;  %4145 = vmatprep.subr.bf16.mxu1 %v4144_v55  ;;  %v1603_v5 = vmax.f32 %v1333_v59, 0.0 }
 0x246   :  { %v1633_v62 = vmax.f32 %v1236_v60, 0.0  ;;  %v1238_v63 = vpop.f32.mrb[65].mxu1  ;;  %4147 = vmatpush1.bf16.msra.mxu1 %v4146_v54 }
 0x247   :  { %v1634_v4 = vmax.f32 %v1238_v63, 0.0  ;;  %3745 = vmatmul.mubr.msk.f32.gmra.mrb[90].mxu0 %vm901_vm1, %v4980_v58  ;;  %v1337_v7 = vpop.f32.mrb[64].mxu0 }
 0x248   :  { %v4154_v8 = vpack.c.bf16 %v1633_v62, %v1622_v61  ;;  %1798 = vmatprep.mubr.f32.mxu0 %v4511_v0  ;;  %v1613_v10 = vmax.f32 %v1337_v7, 0.0  ;;  %v1339_v12 = vpop.f32.mrb[65].mxu0 }
 0x249   :  { %v4152_v13 = vpack.c.bf16 %v1634_v4, %v1623_v3  ;;  %v1242_v14 = vpop.f32.mrb[66].mxu1  ;;  %3751 = vmatmul.mubr.msk.f32.vlgmr.msra.gmra.mrb[90].mxu1 %vm901_vm1, %v4970_v35  ;;  %v1614_v15 = vmax.f32 %v1339_v12, 0.0 }
 0x24a   :  { %v1244_v16 = vpop.f32.mrb[67].mxu1  ;;  %v4166_v17 = vpack.c.bf16 %v1613_v10, %v1602_v2  ;;  %1899 = vmatprep.mubr.f32.mxu1 %v4511_v0  ;;  %v1644_v24 = vmax.f32 %v1242_v14, 0.0 }
 0x24b   :  { %3746 = vmatmul.mubr.msk.f32.gmra.mrb[92].mxu0 %vm901_vm1, %v4985_v9  ;;  %4153 = vmatprep.subr.bf16.mxu0 %v4152_v13  ;;  %v4164_v18 = vpack.c.bf16 %v1614_v15, %v1603_v5  ;;  %v1343_v19 = vpop.f32.mrb[66].mxu0  ;;  %v1645_v28 = vmax.f32 %v1244_v16, 0.0 }
 0x24c   :  { %4155 = vmatpush1.bf16.msra.mxu0 %v4154_v8  ;;  %1804 = vmatprep.mubr.f32.mxu0 %v4511_v0  ;;  %v1345_v21 = vpop.f32.mrb[67].mxu0  ;;  %v1624_v27 = vmax.f32 %v1343_v19, 0.0 }
 0x24d   :  { %v1248_v22 = vpop.f32.mrb[68].mxu1  ;;  %3752 = vmatmul.mubr.msk.f32.gmra.mrb[92].mxu1 %vm901_vm1, %v4975_v48  ;;  %4165 = vmatprep.subr.bf16.mxu1 %v4164_v18  ;;  %v1625_v45 = vmax.f32 %v1345_v21, 0.0 }
 0x24e   :  { %v1655_v25 = vmax.f32 %v1248_v22, 0.0  ;;  %v1250_v26 = vpop.f32.mrb[69].mxu1  ;;  %1905 = vmatprep.mubr.f32.mxu1 %v4511_v0  ;;  %4167 = vmatpush1.bf16.msra.mxu1 %v4166_v17 }
 0x24f   :  { %v1656_v29 = vmax.f32 %v1250_v26, 0.0  ;;  %3747 = vmatmul.mubr.msk.f32.gmra.mrb[94].mxu0 %vm901_vm1, %v4993_v20  ;;  %v1349_v1 = vpop.f32.mrb[68].mxu0 }
 0x250   :  { %v4158_v11 = vpack.c.bf16 %v1655_v25, %v1644_v24  ;;  %1810 = vmatprep.mubr.f32.mxu0 %v4511_v0  ;;  %v1635_v33 = vmax.f32 %v1349_v1, 0.0  ;;  %v1351_v47 = vpop.f32.mrb[69].mxu0 }
 0x251   :  { %v4156_v30 = vpack.c.bf16 %v1656_v29, %v1645_v28  ;;  %v1254_v31 = vpop.f32.mrb[70].mxu1  ;;  %3753 = vmatmul.mubr.msk.f32.gmra.mrb[94].mxu1 %vm901_vm1, %v4980_v58  ;;  %v1636_v32 = vmax.f32 %v1351_v47, 0.0 }
 0x252   :  { %v1256_v34 = vpop.f32.mrb[71].mxu1  ;;  %v4170_v36 = vpack.c.bf16 %v1635_v33, %v1624_v27  ;;  %1911 = vmatprep.mubr.f32.mxu1 %v4511_v0  ;;  %v1666_v40 = vmax.f32 %v1254_v31, 0.0 }
 0x253   :  { %3748 = vmatmul.mubr.msk.f32.gmra.mrb[96].mxu0 %vm901_vm1, %v5001_v23  ;;  %4157 = vmatprep.subr.bf16.mxu0 %v4156_v30  ;;  %v4168_v56 = vpack.c.bf16 %v1636_v32, %v1625_v45  ;;  %v1355_v37 = vpop.f32.mrb[70].mxu0  ;;  %v1667_v46 = vmax.f32 %v1256_v34, 0.0 }
 0x254   :  { %4159 = vmatpush1.bf16.msra.mxu0 %v4158_v11  ;;  %1816 = vmatprep.mubr.f32.mxu0 %v4511_v0  ;;  %v1357_v6 = vpop.f32.mrb[71].mxu0  ;;  %v1646_v44 = vmax.f32 %v1355_v37, 0.0 }
 0x255   :  { %v1260_v39 = vpop.f32.mrb[72].mxu1  ;;  %3754 = vmatmul.mubr.msk.f32.gmra.mrb[96].mxu1 %vm901_vm1, %v4985_v9  ;;  %4169 = vmatprep.subr.bf16.mxu1 %v4168_v56  ;;  %v1647_v50 = vmax.f32 %v1357_v6, 0.0 }
 0x256   :  { %v1677_v41 = vmax.f32 %v1260_v39, 0.0  ;;  %v1262_v42 = vpop.f32.mrb[73].mxu1  ;;  %1917 = vmatprep.mubr.f32.mxu1 %v4511_v0  ;;  %4171 = vmatpush1.bf16.msra.mxu1 %v4170_v36 }
 0x257   :  { %v1678_v49 = vmax.f32 %v1262_v42, 0.0  ;;  %3749 = vmatmul.mubr.msk.f32.gmra.mrb[98].mxu0 %vm901_vm1, %v5009_v38  ;;  %v1361_v51 = vpop.f32.mrb[72].mxu0 }
 0x258   :  { %v4162_v43 = vpack.c.bf16 %v1677_v41, %v1666_v40  ;;  %1822 = vmatprep.mubr.f32.mxu0 %v4511_v0  ;;  %v1657_v53 = vmax.f32 %v1361_v51, 0.0  ;;  %v1363_v54 = vpop.f32.mrb[73].mxu0 }
 0x259   :  { %v4160_v55 = vpack.c.bf16 %v1678_v49, %v1667_v46  ;;  %v1444_v57 = vpop.f32.mrb[74].mxu1  ;;  %3755 = vmatmul.mubr.msk.f32.gmra.mrb[98].mxu1 %vm901_vm1, %v4993_v20  ;;  %v1658_v59 = vmax.f32 %v1363_v54, 0.0 }
 0x25a   :  { %v1446_v60 = vpop.f32.mrb[75].mxu1  ;;  %v4174_v61 = vpack.c.bf16 %v1657_v53, %v1646_v44  ;;  %1923 = vmatprep.mubr.f32.mxu1 %v4511_v0  ;;  %v1604_v4 = vmax.f32 %v1444_v57, 0.0 }
 0x25b   :  { %3750 = vmatmul.mubr.msk.f32.gmra.mrb[100].mxu0 %vm901_vm1, %v5017_v52  ;;  %4161 = vmatprep.subr.bf16.mxu0 %v4160_v55  ;;  %v4172_v62 = vpack.c.bf16 %v1658_v59, %v1647_v50  ;;  %v1367_v63 = vpop.f32.mrb[74].mxu0  ;;  %v1605_v10 = vmax.f32 %v1446_v60, 0.0 }
 0x25c   :  { %4163 = vmatpush1.bf16.msra.mxu0 %v4162_v43  ;;  %2006 = vmatprep.mubr.f32.mxu0 %v4511_v0  ;;  %v1369_v2 = vpop.f32.mrb[75].mxu0  ;;  %v1668_v8 = vmax.f32 %v1367_v63, 0.0 }
 0x25d   :  { %v1450_v3 = vpop.f32.mrb[76].mxu1  ;;  %3756 = vmatmul.mubr.msk.f32.gmra.mrb[100].mxu1 %vm901_vm1, %v5001_v23  ;;  %4173 = vmatprep.subr.bf16.mxu1 %v4172_v62  ;;  %v1669_v13 = vmax.f32 %v1369_v2, 0.0 }
 0x25e   :  { %v1615_v5 = vmax.f32 %v1450_v3, 0.0  ;;  %v1452_v7 = vpop.f32.mrb[77].mxu1  ;;  %1929 = vmatprep.mubr.f32.mxu1 %v4511_v0  ;;  %4175 = vmatpush1.bf16.msra.mxu1 %v4174_v61 }
 0x25f   :  { %v1616_v12 = vmax.f32 %v1452_v7, 0.0  ;;  %3759 = vmatmul.mubr.msk.f32.vlgmr.msra.gmra.mrb[102].mxu0 %vm901_vm1, %v4970_v35  ;;  %v1373_v14 = vpop.f32.mrb[76].mxu0 }
 0x260   :  { %v4182_v15 = vpack.c.bf16 %v1615_v5, %v1604_v4  ;;  %2012 = vmatprep.mubr.f32.mxu0 %v4511_v0  ;;  %v1679_v16 = vmax.f32 %v1373_v14, 0.0  ;;  %v1375_v17 = vpop.f32.mrb[77].mxu0 }
 0x261   :  { %v4180_v18 = vpack.c.bf16 %v1616_v12, %v1605_v10  ;;  %v1456_v19 = vpop.f32.mrb[78].mxu1  ;;  %v1680_v21 = vmax.f32 %v1375_v17, 0.0  ;;  %3757 = vmatmul.mubr.msk.f32.gmra.mrb[102].mxu1 %vm901_vm1, %v5009_v38 }
 0x262   :  { %v1458_v22 = vpop.f32.mrb[79].mxu1  ;;  %v4178_v24 = vpack.c.bf16 %v1679_v16, %v1668_v8  ;;  %1935 = vmatprep.mubr.f32.mxu1 %v4511_v0  ;;  %v1626_v1 = vmax.f32 %v1456_v19, 0.0 }
 0x263   :  { %3760 = vmatmul.mubr.msk.f32.gmra.mrb[104].mxu0 %vm901_vm1, %v4975_v48  ;;  %4181 = vmatprep.subr.bf16.mxu0 %v4180_v18  ;;  %v4176_v25 = vpack.c.bf16 %v1680_v21, %v1669_v13  ;;  %v3925_v26 = vpop.f32.mrb[78].mxu0  ;;  %v1627_v47 = vmax.f32 %v1458_v22, 0.0 }
 0x264   :  { %4183 = vmatpush1.bf16.msra.mxu0 %v4182_v15  ;;  %2018 = vmatprep.mubr.f32.mxu0 %v4511_v0  ;;  %v1617_v27 = vmax.f32 %v3925_v26, 0.0  ;;  %v1557_v28 = vpop.f32.mrb[79].mxu0 }
 0x265   :  { %v1462_v29 = vpop.f32.mrb[80].mxu1  ;;  %3758 = vmatmul.mubr.msk.f32.gmra.mrb[104].mxu1 %vm901_vm1, %v5017_v52  ;;  %4177 = vmatprep.subr.bf16.mxu1 %v4176_v25  ;;  %v1606_v45 = vmax.f32 %v1557_v28, 0.0 }
 0x266   :  { %v1637_v11 = vmax.f32 %v1462_v29, 0.0  ;;  %v1464_v33 = vpop.f32.mrb[81].mxu1  ;;  %4179 = vmatpush1.bf16.msra.mxu1 %v4178_v24  ;;  %2119 = vmatprep.mubr.f32.mxu1 %v4511_v0 }
 0x267   :  { %v1638_v30 = vmax.f32 %v1464_v33, 0.0  ;;  %3761 = vmatmul.mubr.msk.f32.gmra.mrb[106].mxu0 %vm901_vm1, %v4980_v58  ;;  %v4196_v31 = vpack.c.bf16 %v1617_v27, %v1606_v45  ;;  %v3928_v32 = vpop.f32.mrb[80].mxu0 }
 0x268   :  { %v4186_v34 = vpack.c.bf16 %v1637_v11, %v1626_v1  ;;  %2024 = vmatprep.mubr.f32.mxu0 %v4511_v0  ;;  %v1639_v36 = vmax.f32 %v3928_v32, 0.0  ;;  %v1567_v56 = vpop.f32.mrb[81].mxu0 }
 0x269   :  { %v4184_v37 = vpack.c.bf16 %v1638_v30, %v1627_v47  ;;  %v1468_v6 = vpop.f32.mrb[82].mxu1  ;;  %3767 = vmatmul.mubr.msk.f32.vlgmr.msra.gmra.mrb[106].mxu1 %vm901_vm1, %v4970_v35  ;;  %4197 = vmatprep.subr.bf16.mxu1 %v4196_v31  ;;  %v1628_v39 = vmax.f32 %v1567_v56, 0.0 }
 0x26a   :  { %v1470_v40 = vpop.f32.mrb[83].mxu1  ;;  %2125 = vmatprep.mubr.f32.mxu1 %v4511_v0  ;;  %4199 = vmatpush3.bf16.msra.mxu1 %v4196_v31  ;;  %v1648_v51 = vmax.f32 %v1468_v6, 0.0 }
 0x26b   :  { %3762 = vmatmul.mubr.msk.f32.gmra.mrb[108].mxu0 %vm901_vm1, %v4985_v9  ;;  %4185 = vmatprep.subr.bf16.mxu0 %v4184_v37  ;;  %v4200_v41 = vpack.c.bf16 %v1639_v36, %v1628_v39  ;;  %v3931_v42 = vpop.f32.mrb[82].mxu0  ;;  %v1649_v54 = vmax.f32 %v1470_v40, 0.0 }
 0x26c   :  { %4187 = vmatpush1.bf16.msra.mxu0 %v4186_v34  ;;  %2030 = vmatprep.mubr.f32.mxu0 %v4511_v0  ;;  %v1661_v44 = vmax.f32 %v3931_v42, 0.0  ;;  %v1577_v46 = vpop.f32.mrb[83].mxu0 }
 0x26d   :  { %v1474_v49 = vpop.f32.mrb[84].mxu1  ;;  %3768 = vmatmul.mubr.msk.f32.gmra.mrb[108].mxu1 %vm901_vm1, %v4975_v48  ;;  %v1650_v50 = vmax.f32 %v1577_v46, 0.0  ;;  %4201 = vmatprep.subr.bf16.mxu1 %v4200_v41 }
 0x26e   :  { %v1659_v43 = vmax.f32 %v1474_v49, 0.0  ;;  %v1476_v53 = vpop.f32.mrb[85].mxu1  ;;  %2131 = vmatprep.mubr.f32.mxu1 %v4511_v0  ;;  %4203 = vmatpush3.bf16.msra.mxu1 %v4200_v41 }
 0x26f   :  { %v1660_v55 = vmax.f32 %v1476_v53, 0.0  ;;  %3763 = vmatmul.mubr.msk.f32.gmra.mrb[110].mxu0 %vm901_vm1, %v4993_v20  ;;  %v4204_v57 = vpack.c.bf16 %v1661_v44, %v1650_v50  ;;  %v3934_v59 = vpop.f32.mrb[84].mxu0 }
 0x270   :  { %v4190_v60 = vpack.c.bf16 %v1659_v43, %v1648_v51  ;;  %2036 = vmatprep.mubr.f32.mxu0 %v4511_v0  ;;  %v1683_v61 = vmax.f32 %v3934_v59, 0.0  ;;  %v1587_v62 = vpop.f32.mrb[85].mxu0 }
 0x271   :  { %v4188_v63 = vpack.c.bf16 %v1660_v55, %v1649_v54  ;;  %v1480_v2 = vpop.f32.mrb[86].mxu1  ;;  %3769 = vmatmul.mubr.msk.f32.gmra.mrb[110].mxu1 %vm901_vm1, %v4980_v58  ;;  %v1672_v3 = vmax.f32 %v1587_v62, 0.0  ;;  %4205 = vmatprep.subr.bf16.mxu1 %v4204_v57 }
 0x272   :  { %v1482_v4 = vpop.f32.mrb[87].mxu1  ;;  %2137 = vmatprep.mubr.f32.mxu1 %v4511_v0  ;;  %4207 = vmatpush3.bf16.msra.mxu1 %v4204_v57  ;;  %v1670_v8 = vmax.f32 %v1480_v2, 0.0 }
 0x273   :  { %3764 = vmatmul.mubr.msk.f32.gmra.mrb[112].mxu0 %vm901_vm1, %v5001_v23  ;;  %4189 = vmatprep.subr.bf16.mxu0 %v4188_v63  ;;  %v4208_v5 = vpack.c.bf16 %v1683_v61, %v1672_v3  ;;  %v1671_v13 = vmax.f32 %v1482_v4, 0.0 }
 0x274   :  { %4191 = vmatpush1.bf16.msra.mxu0 %v4190_v60  ;;  %2042 = vmatprep.mubr.f32.mxu0 %v4511_v0 }
 0x275   :  { %v1486_v7 = vpop.f32.mrb[88].mxu1  ;;  %3770 = vmatmul.mubr.msk.f32.gmra.mrb[112].mxu1 %vm901_vm1, %v4985_v9  ;;  %4209 = vmatprep.subr.bf16.mxu1 %v4208_v5 }
 0x276   :  { %v1681_v10 = vmax.f32 %v1486_v7, 0.0  ;;  %v1488_v12 = vpop.f32.mrb[89].mxu1  ;;  %2143 = vmatprep.mubr.f32.mxu1 %v4511_v0  ;;  %4211 = vmatpush3.bf16.msra.mxu1 %v4208_v5 }
 0x277   :  { %v1682_v14 = vmax.f32 %v1488_v12, 0.0  ;;  %3765 = vmatmul.mubr.msk.f32.gmra.mrb[114].mxu0 %vm901_vm1, %v5009_v38 }
 0x278   :  { %v4194_v15 = vpack.c.bf16 %v1681_v10, %v1670_v8  ;;  %2048 = vmatprep.mubr.f32.mxu0 %v4511_v0 }
 0x279   :  { %v4192_v16 = vpack.c.bf16 %v1682_v14, %v1671_v13  ;;  %3771 = vmatmul.mubr.msk.f32.gmra.mrb[114].mxu1 %vm901_vm1, %v4993_v20 }
 0x27a   :  { %2149 = vmatprep.mubr.f32.mxu1 %v4511_v0 }
 0x27b   :  { %3766 = vmatmul.mubr.msk.f32.gmra.mrb[116].mxu0 %vm901_vm1, %v5017_v52  ;;  %4193 = vmatprep.subr.bf16.mxu0 %v4192_v16 }
 0x27c   :  { %4195 = vmatpush1.bf16.msra.mxu0 %v4194_v15  ;;  %2232 = vmatprep.mubr.f32.mxu0 %v4511_v0 }
 0x27d   :  { %3772 = vmatmul.mubr.msk.f32.gmra.mrb[116].mxu1 %vm901_vm1, %v5001_v23 }
 0x27e   :  { %2155 = vmatprep.mubr.f32.mxu1 %v4511_v0 }
 0x27f   :  { %3775 = vmatmul.mubr.msk.f32.vlgmr.msra.gmra.mrb[118].mxu0 %vm901_vm1, %v4970_v35 }
 0x280   :  { %2238 = vmatprep.mubr.f32.mxu0 %v4511_v0 }
 0x281   :  { %3773 = vmatmul.mubr.msk.f32.gmra.mrb[118].mxu1 %vm901_vm1, %v5009_v38 }
 0x282   :  { %2161 = vmatprep.mubr.f32.mxu1 %v4511_v0 }
 0x283   :  { %3776 = vmatmul.mubr.msk.f32.gmra.mrb[120].mxu0 %vm901_vm1, %v4975_v48 }
 0x284   :  { %2244 = vmatprep.mubr.f32.mxu0 %v4511_v0 }
 0x285   :  { %3774 = vmatmul.mubr.msk.f32.gmra.mrb[120].mxu1 %vm901_vm1, %v5017_v52 }
 0x286   :  { %3951 = vmatprep.mubr.msk.f32.mxu1 %vm901_vm1, %v4970_v35 }
 0x287   :  { %3777 = vmatmul.mubr.msk.f32.gmra.mrb[122].mxu0 %vm901_vm1, %v4980_v58 }
 0x288   :  { %2250 = vmatprep.mubr.f32.mxu0 %v4511_v0 }
 0x289   :  { %3952 = vmatmul.mubr.msk.f32.vlgmr.msra.gmra.mrb[122].mxu1 %vm901_vm1, %v4975_v48 }
 0x28a   :  { %3954 = vmatprep.mubr.msk.f32.mxu1 %vm901_vm1, %v4980_v58 }
 0x28b   :  { %3778 = vmatmul.mubr.msk.f32.gmra.mrb[124].mxu0 %vm901_vm1, %v4985_v9 }
 0x28c   :  { %2256 = vmatprep.mubr.f32.mxu0 %v4511_v0 }
 0x28d   :  { %3955 = vmatmul.mubr.msk.f32.gmra.mrb[124].mxu1 %vm901_vm1, %v4985_v9 }
 0x28e   :  { %3957 = vmatprep.mubr.msk.f32.mxu1 %vm901_vm1, %v4993_v20 }
 0x28f   :  { %3779 = vmatmul.mubr.msk.f32.gmra.mrb[126].mxu0 %vm901_vm1, %v4993_v20 }
 0x290   :  { %2262 = vmatprep.mubr.f32.mxu0 %v4511_v0 }
 0x291   :  { %3958 = vmatmul.mubr.msk.f32.gmra.mrb[126].mxu1 %vm901_vm1, %v5001_v23 }
 0x292   :  { %3960 = vmatprep.mubr.msk.f32.mxu1 %vm901_vm1, %v5009_v38 }
 0x293   :  { %3780 = vmatmul.mubr.msk.f32.gmra.mrb[128].mxu0 %vm901_vm1, %v5001_v23 }
 0x294   :  { %2268 = vmatprep.mubr.f32.mxu0 %v4511_v0 }
 0x295   :  { %3961 = vmatmul.mubr.msk.f32.gmra.mrb[128].mxu1 %vm901_vm1, %v5017_v52 }
 0x296   :  { %2554 = vmatprep.mubr.f32.mxu1 %v4511_v0 }
 0x297   :  { %3781 = vmatmul.mubr.msk.f32.gmra.mrb[130].mxu0 %vm901_vm1, %v5009_v38 }
 0x298   :  { %2274 = vmatprep.mubr.f32.mxu0 %v4511_v0 }
 0x29b   :  { %3782 = vmatmul.mubr.msk.f32.gmra.mrb[132].mxu0 %vm901_vm1, %v5017_v52 }
 0x29c   :  { %2643 = vmatprep.mubr.f32.mxu0 %v4511_v0 }
 0x312   :  { %v1782_v35 = vpop.f32.mrb[86].mxu0 }
 0x313   :  { %v1784_v48 = vpop.f32.mrb[87].mxu0  ;;  %v2386_v9 = vmax.f32 %v1782_v35, 0.0 }
 0x314   :  { %v2387_v17 = vmax.f32 %v1784_v48, 0.0 }
 0x316   :  { %v1788_v58 = vpop.f32.mrb[88].mxu0 }
 0x317   :  { %v2397_v20 = vmax.f32 %v1788_v58, 0.0  ;;  %v1790_v23 = vpop.f32.mrb[89].mxu0 }
 0x318   :  { %v2398_v18 = vmax.f32 %v1790_v23, 0.0 }
 0x319   :  { %v4214_v19 = vpack.c.bf16 %v2397_v20, %v2386_v9 }
 0x31a   :  { %v4212_v21 = vpack.c.bf16 %v2398_v18, %v2387_v17  ;;  %v1794_v22 = vpop.f32.mrb[90].mxu0 }
 0x31b   :  { %v1796_v24 = vpop.f32.mrb[91].mxu0  ;;  %v2408_v52 = vmax.f32 %v1794_v22, 0.0  ;;  %v5122_v22 = vld [vmem:[#allocation7] sm:$0xff] }
 0x31c   :  { %4213 = vmatprep.subr.bf16.mxu1 %v4212_v21  ;;  %v1895_v38 = vpop.f32.mrb[90].mxu1  ;;  %v2409_v45 = vmax.f32 %v1796_v24, 0.0 }
 0x31d   :  { %4215 = vmatpush1.bf16.msra.mxu1 %v4214_v19  ;;  %v1897_v25 = vpop.f32.mrb[91].mxu1  ;;  %v2388_v29 = vmax.f32 %v1895_v38, 0.0 }
 0x31e   :  { %v1800_v26 = vpop.f32.mrb[92].mxu0  ;;  %v2389_v11 = vmax.f32 %v1897_v25, 0.0 }
 0x31f   :  { %v2419_v27 = vmax.f32 %v1800_v26, 0.0  ;;  %v1802_v28 = vpop.f32.mrb[93].mxu0 }
 0x320   :  { %v2420_v1 = vmax.f32 %v1802_v28, 0.0  ;;  %v1901_v33 = vpop.f32.mrb[92].mxu1 }
 0x321   :  { %v4218_v47 = vpack.c.bf16 %v2419_v27, %v2408_v52  ;;  %v2399_v30 = vmax.f32 %v1901_v33, 0.0  ;;  %v1903_v31 = vpop.f32.mrb[93].mxu1 }
 0x322   :  { %v4216_v32 = vpack.c.bf16 %v2420_v1, %v2409_v45  ;;  %v1806_v34 = vpop.f32.mrb[94].mxu0  ;;  %v2400_v36 = vmax.f32 %v1903_v31, 0.0 }
 0x323   :  { %v1808_v56 = vpop.f32.mrb[95].mxu0  ;;  %v4230_v37 = vpack.c.bf16 %v2399_v30, %v2388_v29  ;;  %v2430_v42 = vmax.f32 %v1806_v34, 0.0  ;;  %v5127_v30 = vld [vmem:[#allocation7 + $0x8] sm:$0xff] }
 0x324   :  { %4217 = vmatprep.subr.bf16.mxu1 %v4216_v32  ;;  %v4228_v6 = vpack.c.bf16 %v2400_v36, %v2389_v11  ;;  %v1907_v39 = vpop.f32.mrb[94].mxu1  ;;  %v2431_v50 = vmax.f32 %v1808_v56, 0.0 }
 0x325   :  { %4219 = vmatpush1.bf16.msra.mxu1 %v4218_v47  ;;  %v1909_v40 = vpop.f32.mrb[95].mxu1  ;;  %v2410_v49 = vmax.f32 %v1907_v39, 0.0 }
 0x326   :  { %v1812_v41 = vpop.f32.mrb[96].mxu0  ;;  %4229 = vmatprep.subr.bf16.mxu0 %v4228_v6  ;;  %v2411_v43 = vmax.f32 %v1909_v40, 0.0  ;;  %v5132_v40 = vld [vmem:[#allocation7 + $0x10] sm:$0xff] }
 0x327   :  { %v2441_v44 = vmax.f32 %v1812_v41, 0.0  ;;  %v1814_v46 = vpop.f32.mrb[97].mxu0  ;;  %4231 = vmatpush1.bf16.msra.mxu0 %v4230_v37 }
 0x328   :  { %v2442_v51 = vmax.f32 %v1814_v46, 0.0  ;;  %v1913_v53 = vpop.f32.mrb[96].mxu1 }
 0x329   :  { %v4222_v54 = vpack.c.bf16 %v2441_v44, %v2430_v42  ;;  %v2421_v55 = vmax.f32 %v1913_v53, 0.0  ;;  %v1915_v57 = vpop.f32.mrb[97].mxu1 }
 0x32a   :  { %v4220_v59 = vpack.c.bf16 %v2442_v51, %v2431_v50  ;;  %v1818_v60 = vpop.f32.mrb[98].mxu0  ;;  %v2422_v61 = vmax.f32 %v1915_v57, 0.0 }
 0x32b   :  { %v1820_v62 = vpop.f32.mrb[99].mxu0  ;;  %v4234_v63 = vpack.c.bf16 %v2421_v55, %v2410_v49  ;;  %v2452_v7 = vmax.f32 %v1818_v60, 0.0 }
 0x32c   :  { %4221 = vmatprep.subr.bf16.mxu1 %v4220_v59  ;;  %v4232_v2 = vpack.c.bf16 %v2422_v61, %v2411_v43  ;;  %v1919_v3 = vpop.f32.mrb[98].mxu1  ;;  %v2453_v13 = vmax.f32 %v1820_v62, 0.0  ;;  %v5137_v59 = vld [vmem:[#allocation7 + $0x18] sm:$0x7] }
 0x32d   :  { %4223 = vmatpush1.bf16.msra.mxu1 %v4222_v54  ;;  %v1921_v4 = vpop.f32.mrb[99].mxu1  ;;  %v2432_v12 = vmax.f32 %v1919_v3, 0.0 }
 0x32e   :  { %v1824_v5 = vpop.f32.mrb[100].mxu0  ;;  %4233 = vmatprep.subr.bf16.mxu0 %v4232_v2  ;;  %v2433_v15 = vmax.f32 %v1921_v4, 0.0 }
 0x32f   :  { %v2463_v8 = vmax.f32 %v1824_v5, 0.0  ;;  %v1826_v10 = vpop.f32.mrb[101].mxu0  ;;  %4235 = vmatpush1.bf16.msra.mxu0 %v4234_v63 }
 0x330   :  { %v2464_v14 = vmax.f32 %v1826_v10, 0.0  ;;  %v1925_v16 = vpop.f32.mrb[100].mxu1 }
 0x331   :  { %v4226_v35 = vpack.c.bf16 %v2463_v8, %v2452_v7  ;;  %v2443_v48 = vmax.f32 %v1925_v16, 0.0  ;;  %v1927_v58 = vpop.f32.mrb[101].mxu1 }
 0x332   :  { %v4224_v9 = vpack.c.bf16 %v2464_v14, %v2453_v13  ;;  %v2008_v20 = vpop.f32.mrb[102].mxu0  ;;  %v2444_v23 = vmax.f32 %v1927_v58, 0.0 }
 0x333   :  { %v2010_v17 = vpop.f32.mrb[103].mxu0  ;;  %v4238_v18 = vpack.c.bf16 %v2443_v48, %v2432_v12  ;;  %v2390_v25 = vmax.f32 %v2008_v20, 0.0 }
 0x334   :  { %4225 = vmatprep.subr.bf16.mxu1 %v4224_v9  ;;  %v4236_v19 = vpack.c.bf16 %v2444_v23, %v2433_v15  ;;  %v1931_v21 = vpop.f32.mrb[102].mxu1  ;;  %v2391_v28 = vmax.f32 %v2010_v17, 0.0 }
 0x335   :  { %4227 = vmatpush1.bf16.msra.mxu1 %v4226_v35  ;;  %v1933_v24 = vpop.f32.mrb[103].mxu1  ;;  %v2454_v27 = vmax.f32 %v1931_v21, 0.0 }
 0x336   :  { %v2014_v38 = vpop.f32.mrb[104].mxu0  ;;  %4237 = vmatprep.subr.bf16.mxu0 %v4236_v19  ;;  %v2455_v45 = vmax.f32 %v1933_v24, 0.0 }
 0x337   :  { %v2401_v26 = vmax.f32 %v2014_v38, 0.0  ;;  %v2016_v52 = vpop.f32.mrb[105].mxu0  ;;  %4239 = vmatpush1.bf16.msra.mxu0 %v4238_v18 }
 0x338   :  { %v2402_v29 = vmax.f32 %v2016_v52, 0.0  ;;  %3791 = vmatmul.mubr.msk.f32.vlgmr.msra.gmra.mrb[130].mxu1 %vm901_vm1, %v5122_v22  ;;  %v1937_v1 = vpop.f32.mrb[104].mxu1 }
 0x339   :  { %v4246_v11 = vpack.c.bf16 %v2401_v26, %v2390_v25  ;;  %v2465_v33 = vmax.f32 %v1937_v1, 0.0  ;;  %v1939_v47 = vpop.f32.mrb[105].mxu1  ;;  %2560 = vmatprep.mubr.f32.mxu1 %v4511_v0 }
 0x33a   :  { %v4244_v31 = vpack.c.bf16 %v2402_v29, %v2391_v28  ;;  %v2020_v32 = vpop.f32.mrb[106].mxu0  ;;  %v2466_v34 = vmax.f32 %v1939_v47, 0.0 }
 0x33b   :  { %v2022_v36 = vpop.f32.mrb[107].mxu0  ;;  %v4242_v56 = vpack.c.bf16 %v2465_v33, %v2454_v27  ;;  %v2412_v42 = vmax.f32 %v2020_v32, 0.0 }
 0x33c   :  { %4245 = vmatprep.subr.bf16.mxu1 %v4244_v31  ;;  %v4240_v37 = vpack.c.bf16 %v2466_v34, %v2455_v45  ;;  %v2121_v6 = vpop.f32.mrb[106].mxu1  ;;  %3792 = vmatmul.mubr.msk.f32.gmra.mrb[132].mxu1 %vm901_vm1, %v5127_v30  ;;  %v2413_v50 = vmax.f32 %v2022_v36, 0.0 }
 0x33d   :  { %4247 = vmatpush1.bf16.msra.mxu1 %v4246_v11  ;;  %v2123_v39 = vpop.f32.mrb[107].mxu1  ;;  %2566 = vmatprep.mubr.f32.mxu1 %v4511_v0  ;;  %v2392_v49 = vmax.f32 %v2121_v6, 0.0 }
 0x33e   :  { %v2026_v41 = vpop.f32.mrb[108].mxu0  ;;  %4241 = vmatprep.subr.bf16.mxu0 %v4240_v37  ;;  %v2393_v43 = vmax.f32 %v2123_v39, 0.0 }
 0x33f   :  { %v2423_v44 = vmax.f32 %v2026_v41, 0.0  ;;  %v2028_v46 = vpop.f32.mrb[109].mxu0  ;;  %4243 = vmatpush1.bf16.msra.mxu0 %v4242_v56 }
 0x340   :  { %v2424_v51 = vmax.f32 %v2028_v46, 0.0  ;;  %v2127_v53 = vpop.f32.mrb[108].mxu1  ;;  %3793 = vmatmul.mubr.msk.f32.gmra.mrb[134].mxu1 %vm901_vm1, %v5132_v40 }
 0x341   :  { %v4250_v54 = vpack.c.bf16 %v2423_v44, %v2412_v42  ;;  %v2403_v55 = vmax.f32 %v2127_v53, 0.0  ;;  %v2129_v57 = vpop.f32.mrb[109].mxu1  ;;  %2572 = vmatprep.mubr.f32.mxu1 %v4511_v0 }
 0x342   :  { %v4248_v60 = vpack.c.bf16 %v2424_v51, %v2413_v50  ;;  %v2032_v61 = vpop.f32.mrb[110].mxu0  ;;  %v2404_v62 = vmax.f32 %v2129_v57, 0.0  ;;  %3795 = vmatmul.mubr.msk.f32.vlgmr.msra.gmra.mrb[134].mxu0 %vm901_vm1, %v5122_v22 }
 0x343   :  { %v2034_v63 = vpop.f32.mrb[111].mxu0  ;;  %v4262_v2 = vpack.c.bf16 %v2403_v55, %v2392_v49  ;;  %2649 = vmatprep.mubr.f32.mxu0 %v4511_v0  ;;  %v2434_v8 = vmax.f32 %v2032_v61, 0.0 }
 0x344   :  { %4249 = vmatprep.subr.bf16.mxu1 %v4248_v60  ;;  %v4260_v3 = vpack.c.bf16 %v2404_v62, %v2393_v43  ;;  %v2133_v4 = vpop.f32.mrb[110].mxu1  ;;  %3794 = vmatmul.mubr.msk.f32.gmra.mrb[136].mxu1 %vm901_vm1, %v5137_v59  ;;  %v2435_v14 = vmax.f32 %v2034_v63, 0.0 }
 0x345   :  { %4251 = vmatpush1.bf16.msra.mxu1 %v4250_v54  ;;  %v2135_v5 = vpop.f32.mrb[111].mxu1  ;;  %2732 = vmatprep.mubr.f32.mxu1 %v4511_v0  ;;  %v2414_v13 = vmax.f32 %v2133_v4, 0.0 }
 0x346   :  { %v2038_v7 = vpop.f32.mrb[112].mxu0  ;;  %4261 = vmatprep.subr.bf16.mxu0 %v4260_v3  ;;  %3796 = vmatmul.mubr.msk.f32.gmra.mrb[136].mxu0 %vm901_vm1, %v5127_v30  ;;  %v2415_v16 = vmax.f32 %v2135_v5, 0.0 }
 0x347   :  { %v2445_v10 = vmax.f32 %v2038_v7, 0.0  ;;  %v2040_v12 = vpop.f32.mrb[113].mxu0  ;;  %4263 = vmatpush1.bf16.msra.mxu0 %v4262_v2  ;;  %2655 = vmatprep.mubr.f32.mxu0 %v4511_v0 }
 0x348   :  { %v2446_v15 = vmax.f32 %v2040_v12, 0.0  ;;  %v2139_v35 = vpop.f32.mrb[112].mxu1 }
 0x349   :  { %v4254_v48 = vpack.c.bf16 %v2445_v10, %v2434_v8  ;;  %v2425_v58 = vmax.f32 %v2139_v35, 0.0  ;;  %v2141_v9 = vpop.f32.mrb[113].mxu1 }
 0x34a   :  { %v4252_v20 = vpack.c.bf16 %v2446_v15, %v2435_v14  ;;  %v2044_v23 = vpop.f32.mrb[114].mxu0  ;;  %v2426_v17 = vmax.f32 %v2141_v9, 0.0  ;;  %3797 = vmatmul.mubr.msk.f32.gmra.mrb[138].mxu0 %vm901_vm1, %v5132_v40 }
 0x34b   :  { %v2046_v18 = vpop.f32.mrb[115].mxu0  ;;  %v4266_v19 = vpack.c.bf16 %v2425_v58, %v2414_v13  ;;  %2661 = vmatprep.mubr.f32.mxu0 %v4511_v0  ;;  %v2456_v26 = vmax.f32 %v2044_v23, 0.0 }
 0x34c   :  { %4253 = vmatprep.subr.bf16.mxu1 %v4252_v20  ;;  %v4264_v21 = vpack.c.bf16 %v2426_v17, %v2415_v16  ;;  %v2145_v24 = vpop.f32.mrb[114].mxu1  ;;  %v2457_v29 = vmax.f32 %v2046_v18, 0.0 }
 0x34d   :  { %4255 = vmatpush1.bf16.msra.mxu1 %v4254_v48  ;;  %v2147_v38 = vpop.f32.mrb[115].mxu1  ;;  %v2436_v28 = vmax.f32 %v2145_v24, 0.0 }
 0x34e   :  { %v2050_v25 = vpop.f32.mrb[116].mxu0  ;;  %4265 = vmatprep.subr.bf16.mxu0 %v4264_v21  ;;  %3798 = vmatmul.mubr.msk.f32.gmra.mrb[140].mxu0 %vm901_vm1, %v5137_v59  ;;  %v2437_v1 = vmax.f32 %v2147_v38, 0.0 }
 0x34f   :  { %v2467_v52 = vmax.f32 %v2050_v25, 0.0  ;;  %v2052_v27 = vpop.f32.mrb[117].mxu0  ;;  %4267 = vmatpush1.bf16.msra.mxu0 %v4266_v19  ;;  %2821 = vmatprep.mubr.f32.mxu0 %v4511_v0 }
 0x350   :  { %v2468_v45 = vmax.f32 %v2052_v27, 0.0  ;;  %v2151_v11 = vpop.f32.mrb[116].mxu1 }
 0x351   :  { %v4258_v33 = vpack.c.bf16 %v2467_v52, %v2456_v26  ;;  %v2447_v47 = vmax.f32 %v2151_v11, 0.0  ;;  %v2153_v31 = vpop.f32.mrb[117].mxu1 }
 0x352   :  { %v4256_v32 = vpack.c.bf16 %v2468_v45, %v2457_v29  ;;  %v2234_v34 = vpop.f32.mrb[118].mxu0  ;;  %v2448_v36 = vmax.f32 %v2153_v31, 0.0 }
 0x353   :  { %v2236_v56 = vpop.f32.mrb[119].mxu0  ;;  %v4270_v37 = vpack.c.bf16 %v2447_v47, %v2436_v28  ;;  %v2394_v44 = vmax.f32 %v2234_v34, 0.0 }
 0x354   :  { %4257 = vmatprep.subr.bf16.mxu1 %v4256_v32  ;;  %v4268_v6 = vpack.c.bf16 %v2448_v36, %v2437_v1  ;;  %v2157_v39 = vpop.f32.mrb[118].mxu1  ;;  %v2395_v51 = vmax.f32 %v2236_v56, 0.0 }
 0x355   :  { %4259 = vmatpush1.bf16.msra.mxu1 %v4258_v33  ;;  %v2159_v41 = vpop.f32.mrb[119].mxu1  ;;  %v2458_v50 = vmax.f32 %v2157_v39, 0.0 }
 0x356   :  { %v2240_v42 = vpop.f32.mrb[120].mxu0  ;;  %4269 = vmatprep.subr.bf16.mxu0 %v4268_v6  ;;  %v2459_v53 = vmax.f32 %v2159_v41, 0.0 }
 0x357   :  { %v2405_v46 = vmax.f32 %v2240_v42, 0.0  ;;  %v2242_v49 = vpop.f32.mrb[121].mxu0  ;;  %4271 = vmatpush1.bf16.msra.mxu0 %v4270_v37 }
 0x358   :  { %v2406_v43 = vmax.f32 %v2242_v49, 0.0  ;;  %3799 = vmatmul.mubr.msk.f32.vlgmr.msra.gmra.mrb[138].mxu1 %vm901_vm1, %v5122_v22  ;;  %v2163_v54 = vpop.f32.mrb[120].mxu1 }
 0x359   :  { %v4278_v55 = vpack.c.bf16 %v2405_v46, %v2394_v44  ;;  %v2469_v57 = vmax.f32 %v2163_v54, 0.0  ;;  %v2165_v60 = vpop.f32.mrb[121].mxu1  ;;  %2738 = vmatprep.mubr.f32.mxu1 %v4511_v0 }
 0x35a   :  { %v4276_v61 = vpack.c.bf16 %v2406_v43, %v2395_v51  ;;  %v2246_v62 = vpop.f32.mrb[122].mxu0  ;;  %v2470_v63 = vmax.f32 %v2165_v60, 0.0 }
 0x35b   :  { %v2248_v2 = vpop.f32.mrb[123].mxu0  ;;  %v4274_v3 = vpack.c.bf16 %v2469_v57, %v2458_v50  ;;  %v2416_v13 = vmax.f32 %v2246_v62, 0.0 }
 0x35c   :  { %4277 = vmatprep.subr.bf16.mxu1 %v4276_v61  ;;  %v4272_v4 = vpack.c.bf16 %v2470_v63, %v2459_v53  ;;  %v3953_v5 = vpop.f32.mrb[122].mxu1  ;;  %3800 = vmatmul.mubr.msk.f32.gmra.mrb[140].mxu1 %vm901_vm1, %v5127_v30  ;;  %v2417_v16 = vmax.f32 %v2248_v2, 0.0 }
 0x35d   :  { %4279 = vmatpush1.bf16.msra.mxu1 %v4278_v55  ;;  %v2407_v7 = vmax.f32 %v3953_v5, 0.0  ;;  %v2347_v8 = vpop.f32.mrb[123].mxu1  ;;  %2744 = vmatprep.mubr.f32.mxu1 %v4511_v0 }
 0x35e   :  { %v2252_v10 = vpop.f32.mrb[124].mxu0  ;;  %v2396_v12 = vmax.f32 %v2347_v8, 0.0  ;;  %4273 = vmatprep.subr.bf16.mxu0 %v4272_v4 }
 0x35f   :  { %v2427_v14 = vmax.f32 %v2252_v10, 0.0  ;;  %v2254_v15 = vpop.f32.mrb[125].mxu0  ;;  %4275 = vmatpush1.bf16.msra.mxu0 %v4274_v3 }
 0x360   :  { %v2428_v35 = vmax.f32 %v2254_v15, 0.0  ;;  %v4292_v48 = vpack.c.bf16 %v2407_v7, %v2396_v12  ;;  %v3956_v58 = vpop.f32.mrb[124].mxu1  ;;  %3801 = vmatmul.mubr.msk.f32.gmra.mrb[142].mxu1 %vm901_vm1, %v5132_v40  ;;  %v5210_v12 = vld [vmem:[%s5285_s5] sm:$0x7]  ;;  %s4515_s5 = smov [#allocation10]  }
 0x361   :  { %v4282_v9 = vpack.c.bf16 %v2427_v14, %v2416_v13  ;;  %v2429_v20 = vmax.f32 %v3956_v58, 0.0  ;;  %v2357_v23 = vpop.f32.mrb[125].mxu1  ;;  %2750 = vmatprep.mubr.f32.mxu1 %v4511_v0  ;;  %s3636_s30 = sshll.u32 %s4515_s5, 4  ;;  %s3637_s30 = int_to_ptr.vmem [resolvable:$true] %s3636_s30 }
 0x362   :  { %v4280_v17 = vpack.c.bf16 %v2428_v35, %v2417_v16  ;;  %v2258_v18 = vpop.f32.mrb[126].mxu0  ;;  %v2418_v19 = vmax.f32 %v2357_v23, 0.0  ;;  %3803 = vmatmul.mubr.msk.f32.vlgmr.msra.gmra.mrb[142].mxu0 %vm901_vm1, %v5122_v22  ;;  %4293 = vmatprep.subr.bf16.mxu0 %v4292_v48  ;;  %s4473_s8 = scalar_lea.vmem %s3637_s30, 704  ;;  %p4478_p5 = scmp.lt.s32.totalorder %s3637_s30, %s3637_s30 }
 0x363   :  { %v2260_v21 = vpop.f32.mrb[127].mxu0  ;;  %4295 = vmatpush3.bf16.msra.mxu0 %v4292_v48  ;;  %2827 = vmatprep.mubr.f32.mxu0 %v4511_v0  ;;  %v2438_v28 = vmax.f32 %v2258_v18, 0.0  ;;  %p4474_p4 = scmp.ne.s32.totalorder %s3637_s30, %s4473_s8  ;;  %p4479_p6 = scmp.lt.s32.totalorder %s4473_s8, %s4473_s8 }
 0x364   :  { %4281 = vmatprep.subr.bf16.mxu1 %v4280_v17  ;;  %v4296_v24 = vpack.c.bf16 %v2429_v20, %v2418_v19  ;;  %v3959_v38 = vpop.f32.mrb[126].mxu1  ;;  %3802 = vmatmul.mubr.msk.f32.gmra.mrb[144].mxu1 %vm901_vm1, %v5137_v59  ;;  %v2439_v1 = vmax.f32 %v2260_v21, 0.0 }
 0x365   :  { %4283 = vmatpush1.bf16.msra.mxu1 %v4282_v9  ;;  %v2451_v25 = vmax.f32 %v3959_v38, 0.0  ;;  %v2367_v26 = vpop.f32.mrb[127].mxu1  ;;  %2910 = vmatprep.mubr.f32.mxu1 %v4511_v0  ;;  %p4480_p7 = por %p4479_p6, %p4478_p5 }
 0x366   :  { %v2264_v52 = vpop.f32.mrb[128].mxu0  ;;  %v2440_v27 = vmax.f32 %v2367_v26, 0.0  ;;  %3804 = vmatmul.mubr.msk.f32.gmra.mrb[144].mxu0 %vm901_vm1, %v5127_v30  ;;  %4297 = vmatprep.subr.bf16.mxu0 %v4296_v24 }
 0x367   :  { %v2449_v29 = vmax.f32 %v2264_v52, 0.0  ;;  %v2266_v45 = vpop.f32.mrb[129].mxu0  ;;  %4299 = vmatpush3.bf16.msra.mxu0 %v4296_v24  ;;  %2833 = vmatprep.mubr.f32.mxu0 %v4511_v0  ;;  %p4481_p8 = pnand %p4480_p7, %p4474_p4 }
 0x368   :  { %v2450_v11 = vmax.f32 %v2266_v45, 0.0  ;;  %v4300_v33 = vpack.c.bf16 %v2451_v25, %v2440_v27  ;;  %v3962_v47 = vpop.f32.mrb[128].mxu1 }
 0x369   :  { %v4286_v31 = vpack.c.bf16 %v2449_v29, %v2438_v28  ;;  %v2473_v32 = vmax.f32 %v3962_v47, 0.0  ;;  %v2377_v34 = vpop.f32.mrb[129].mxu1 }
 0x36a   :  { %v4284_v36 = vpack.c.bf16 %v2450_v11, %v2439_v1  ;;  %v2270_v56 = vpop.f32.mrb[130].mxu0  ;;  %v2462_v37 = vmax.f32 %v2377_v34, 0.0  ;;  %3805 = vmatmul.mubr.msk.f32.gmra.mrb[146].mxu0 %vm901_vm1, %v5132_v40  ;;  %4301 = vmatprep.subr.bf16.mxu0 %v4300_v33 }
 0x36b   :  { %v2272_v6 = vpop.f32.mrb[131].mxu0  ;;  %4303 = vmatpush3.bf16.msra.mxu0 %v4300_v33  ;;  %2839 = vmatprep.mubr.f32.mxu0 %v4511_v0  ;;  %v2460_v42 = vmax.f32 %v2270_v56, 0.0 }
 0x36c   :  { %4285 = vmatprep.subr.bf16.mxu1 %v4284_v36  ;;  %v4304_v39 = vpack.c.bf16 %v2473_v32, %v2462_v37  ;;  %v2461_v49 = vmax.f32 %v2272_v6, 0.0  ;;  %v4513_v6 = vmov 0.0|0.0  }
 0x36d   :  { %4287 = vmatpush1.bf16.msra.mxu1 %v4286_v31 }
 0x36e   :  { %v2276_v41 = vpop.f32.mrb[132].mxu0  ;;  %3806 = vmatmul.mubr.msk.f32.gmra.mrb[148].mxu0 %vm901_vm1, %v5137_v59  ;;  %4305 = vmatprep.subr.bf16.mxu0 %v4304_v39 }
 0x36f   :  { %v2471_v44 = vmax.f32 %v2276_v41, 0.0  ;;  %v2278_v46 = vpop.f32.mrb[133].mxu0  ;;  %4307 = vmatpush3.bf16.msra.mxu0 %v4304_v39  ;;  %3979 = vmatprep.mubr.msk.f32.mxu0 %vm901_vm1, %v5122_v22 }
 0x370   :  { %v2472_v50 = vmax.f32 %v2278_v46, 0.0 }
 0x371   :  { %v4290_v51 = vpack.c.bf16 %v2471_v44, %v2460_v42 }
 0x372   :  { %v4288_v43 = vpack.c.bf16 %v2472_v50, %v2461_v49  ;;  %3980 = vmatmul.mubr.msk.f32.vlgmr.msra.gmra.mrb[150].mxu0 %vm901_vm1, %v5127_v30 }
 0x373   :  { %3982 = vmatprep.mubr.msk.f32.mxu0 %vm901_vm1, %v5132_v40 }
 0x374   :  { %4289 = vmatprep.subr.bf16.mxu1 %v4288_v43 }
 0x375   :  { %4291 = vmatpush1.bf16.msra.mxu1 %v4290_v51 }
 0x376   :  { %3983 = vmatmul.mubr.msk.f32.gmra.mrb[152].mxu0 %vm901_vm1, %v5137_v59 }
 0x377   :  { %3215 = vmatprep.mubr.f32.mxu0 %v4511_v0 }
 0x378   :  { %3807 = vmatmul.mubr.msk.f32.vlgmr.msra.gmra.mrb[146].mxu1 %vm901_vm1, %v5122_v22 }
 0x379   :  { %2916 = vmatprep.mubr.f32.mxu1 %v4511_v0 }
 0x37c   :  { %3808 = vmatmul.mubr.msk.f32.gmra.mrb[148].mxu1 %vm901_vm1, %v5127_v30 }
 0x37d   :  { %2922 = vmatprep.mubr.f32.mxu1 %v4511_v0 }
 0x380   :  { %3809 = vmatmul.mubr.msk.f32.gmra.mrb[150].mxu1 %vm901_vm1, %v5132_v40 }
 0x381   :  { %2928 = vmatprep.mubr.f32.mxu1 %v4511_v0 }
 0x384   :  { %3810 = vmatmul.mubr.msk.f32.gmra.mrb[152].mxu1 %vm901_vm1, %v5137_v59 }
 0x385   :  { %3144 = vmatprep.mubr.f32.mxu1 %v4511_v0 }
 0x40b   :  { %v2556_v53 = vpop.f32.mrb[130].mxu1 }
 0x40c   :  { %v2558_v54 = vpop.f32.mrb[131].mxu1 }
 0x40f   :  { %v2562_v22 = vpop.f32.mrb[132].mxu1 }
 0x410   :  { %v4310_v55 = vpack.c.bf16 %v2562_v22, %v2556_v53  ;;  %v2564_v57 = vpop.f32.mrb[133].mxu1 }
 0x411   :  { %v4308_v60 = vpack.c.bf16 %v2564_v57, %v2558_v54 }
 0x413   :  { %4309 = vmatprep.subr.bf16.mxu1 %v4308_v60  ;;  %v2568_v30 = vpop.f32.mrb[134].mxu1  ;;  %v3021_v60 = vld [vmem:[#allocation8] sm:$0x77] }
 0x414   :  { %4311 = vmatpush1.bf16.msra.mxu1 %v4310_v55  ;;  %v2570_v61 = vpop.f32.mrb[135].mxu1 }
 0x415   :  { %v2645_v62 = vpop.f32.mrb[134].mxu0 }
 0x416   :  { %v2647_v40 = vpop.f32.mrb[135].mxu0 }
 0x417   :  { %v2574_v63 = vpop.f32.mrb[136].mxu1 }
 0x418   :  { %v4315_v2 = vpack.c.bf16 %v2574_v63, %v2568_v30  ;;  %v2576_v3 = vpop.f32.mrb[137].mxu1  ;;  %v3032_v30 = vcombine.high %v3021_v60, %v3021_v60 }
 0x419   :  { %v4312_v4 = vpack.c.bf16 %v2576_v3, %v2570_v61  ;;  %v2651_v5 = vpop.f32.mrb[136].mxu0 }
 0x41a   :  { %v4320_v7 = vpack.c.bf16 %v2651_v5, %v2645_v62  ;;  %v2653_v8 = vpop.f32.mrb[137].mxu0  ;;  %v3022_v5 = vld [vmem:[#allocation8 + $0x8] sm:$0x77] }
 0x41b   :  { %v4318_v10 = vpack.c.bf16 %v2653_v8, %v2647_v40  ;;  %4314 = vmatprep.subr.msk.bf16.mxu1 %vm5199_vm4, %v4312_v4 }
 0x41c   :  { %4317 = vmatpush1.bf16.msk.msra.mxu1 %vm5199_vm4, %v4315_v2 }
 0x41d   :  { %4319 = vmatprep.subr.bf16.mxu0 %v4318_v10  ;;  %v2657_v13 = vpop.f32.mrb[138].mxu0 }
 0x41e   :  { %4321 = vmatpush1.bf16.msra.mxu0 %v4320_v7  ;;  %v2659_v14 = vpop.f32.mrb[139].mxu0 }
 0x41f   :  { %3817 = vmatmul.mubr.msk.f32.vlgmr.msra.gmra.mrb[154].mxu1 %vm3042_vm5, %v5210_v12 }
 0x420   :  { %3286 = vmatprep.mubr.f32.mxu1 %v4511_v0 }
 0x421   :  { %v2663_v15 = vpop.f32.mrb[140].mxu0 }
 0x422   :  { %v4325_v16 = vpack.c.bf16 %v2663_v15, %v2657_v13  ;;  %v2665_v35 = vpop.f32.mrb[141].mxu0  ;;  %v3033_v13 = vcombine.high %v3022_v5, %v3022_v5 }
 0x423   :  { %v4322_v48 = vpack.c.bf16 %v2665_v35, %v2659_v14 }
 0x425   :  { %4324 = vmatprep.subr.msk.bf16.mxu0 %vm5199_vm4, %v4322_v48 }
 0x426   :  { %4327 = vmatpush1.bf16.msk.msra.mxu0 %vm5199_vm4, %v4325_v16 }
 0x429   :  { %3820 = vmatmul.mubr.msk.f32.vlgmr.msra.gmra.mrb[154].mxu0 %vm3042_vm5, %v5210_v12 }
 0x42a   :  { %3357 = vmatprep.mubr.f32.mxu0 %v4511_v0 }
 0x42b   :  { %v2734_v58 = vpop.f32.mrb[138].mxu1 }
 0x42c   :  { %v2736_v9 = vpop.f32.mrb[139].mxu1 }
 0x42f   :  { %v2740_v20 = vpop.f32.mrb[140].mxu1 }
 0x430   :  { %v4330_v23 = vpack.c.bf16 %v2740_v20, %v2734_v58  ;;  %v2742_v17 = vpop.f32.mrb[141].mxu1 }
 0x431   :  { %v4328_v18 = vpack.c.bf16 %v2742_v17, %v2736_v9 }
 0x433   :  { %4329 = vmatprep.subr.bf16.mxu1 %v4328_v18  ;;  %v2746_v19 = vpop.f32.mrb[142].mxu1 }
 0x434   :  { %4331 = vmatpush1.bf16.msra.mxu1 %v4330_v23  ;;  %v2748_v21 = vpop.f32.mrb[143].mxu1 }
 0x435   :  { %v2823_v24 = vpop.f32.mrb[142].mxu0 }
 0x436   :  { %v2825_v38 = vpop.f32.mrb[143].mxu0 }
 0x437   :  { %v2752_v25 = vpop.f32.mrb[144].mxu1 }
 0x438   :  { %v4335_v26 = vpack.c.bf16 %v2752_v25, %v2746_v19  ;;  %v2754_v52 = vpop.f32.mrb[145].mxu1 }
 0x439   :  { %v2829_v27 = vpop.f32.mrb[144].mxu0  ;;  %v4332_v28 = vpack.c.bf16 %v2754_v52, %v2748_v21 }
 0x43a   :  { %v4340_v29 = vpack.c.bf16 %v2829_v27, %v2823_v24  ;;  %v2831_v45 = vpop.f32.mrb[145].mxu0 }
 0x43b   :  { %v4338_v1 = vpack.c.bf16 %v2831_v45, %v2825_v38  ;;  %4334 = vmatprep.subr.msk.bf16.mxu1 %vm5199_vm4, %v4332_v28 }
 0x43c   :  { %4337 = vmatpush1.bf16.msk.msra.mxu1 %vm5199_vm4, %v4335_v26 }
 0x43d   :  { %v2835_v11 = vpop.f32.mrb[146].mxu0  ;;  %4339 = vmatprep.subr.bf16.mxu0 %v4338_v1 }
 0x43e   :  { %v2837_v33 = vpop.f32.mrb[147].mxu0  ;;  %4341 = vmatpush1.bf16.msra.mxu0 %v4340_v29 }
 0x43f   :  { %3823 = vmatmul.mubr.msk.f32.vlgmr.msra.gmra.mrb[156].mxu1 %vm3042_vm5, %v5210_v12 }
 0x440   :  { %3428 = vmatprep.mubr.f32.mxu1 %v4511_v0 }
 0x441   :  { %v2841_v47 = vpop.f32.mrb[148].mxu0 }
 0x442   :  { %v4345_v31 = vpack.c.bf16 %v2841_v47, %v2835_v11  ;;  %v2843_v32 = vpop.f32.mrb[149].mxu0 }
 0x443   :  { %v4342_v34 = vpack.c.bf16 %v2843_v32, %v2837_v33 }
 0x445   :  { %4344 = vmatprep.subr.msk.bf16.mxu0 %vm5199_vm4, %v4342_v34  ;;  %v3981_v36 = vpop.f32.mrb[150].mxu0 }
 0x446   :  { %4347 = vmatpush1.bf16.msk.msra.mxu0 %vm5199_vm4, %v4345_v31  ;;  %v3001_v56 = vpop.f32.mrb[151].mxu0 }
 0x447   :  { %v4359_v37 = vpack.c.bf16 %v3981_v36, %v3001_v56  ;;  %4358 = vmatprep.subr.bf16.mxu0 %v4513_v6 }
 0x449   :  { %3826 = vmatmul.mubr.msk.f32.vlgmr.msra.gmra.mrb[156].mxu0 %vm3042_vm5, %v5210_v12  ;;  %v3984_v39 = vpop.f32.mrb[152].mxu0 }
 0x44a   :  { %4360 = vmatpush3.bf16.msra.mxu0 %v4359_v37  ;;  %v3011_v41 = vpop.f32.mrb[153].mxu0  ;;  %3993 = vmatprep.mubr.msk.f32.mxu0 %vm4514_vm6, %v4511_v0  ;;  %v3023_v37 = vld [vmem:[#allocation8 + $0x10] sm:$0x77] }
 0x44b   :  { %v2912_v42 = vpop.f32.mrb[146].mxu1  ;;  %v4362_v44 = vpack.c.bf16 %v3984_v39, %v3011_v41  ;;  %4361 = vmatprep.subr.bf16.mxu0 %v4513_v6 }
 0x44c   :  { %v2914_v46 = vpop.f32.mrb[147].mxu1 }
 0x44e   :  { %4364 = vmatpush3.bf16.msk.msra.mxu0 %vm5199_vm4, %v4362_v44 }
 0x44f   :  { %v2918_v49 = vpop.f32.mrb[148].mxu1 }
 0x450   :  { %v4350_v50 = vpack.c.bf16 %v2918_v49, %v2912_v42  ;;  %v2920_v51 = vpop.f32.mrb[149].mxu1  ;;  %v3034_v42 = vcombine.high %v3023_v37, %v3023_v37 }
 0x451   :  { %v4348_v43 = vpack.c.bf16 %v2920_v51, %v2914_v46  ;;  %3994 = vmatmul.mubr.msk.f32.vlgmr.msra.gmra.mrb[158].mxu0 %vm3042_vm5, %v5210_v12 }
 0x453   :  { %4349 = vmatprep.subr.bf16.mxu1 %v4348_v43  ;;  %v2924_v53 = vpop.f32.mrb[150].mxu1 }
 0x454   :  { %4351 = vmatpush1.bf16.msra.mxu1 %v4350_v50  ;;  %v2926_v54 = vpop.f32.mrb[151].mxu1 }
 0x457   :  { %v2930_v22 = vpop.f32.mrb[152].mxu1 }
 0x458   :  { %v4355_v0 = vpack.c.bf16 %v2930_v22, %v2924_v53  ;;  %v2932_v55 = vpop.f32.mrb[153].mxu1 }
 0x459   :  { %v4352_v57 = vpack.c.bf16 %v2932_v55, %v2926_v54  ;;  %v3024_v54 = vld [vmem:[#allocation8 + $0x18] sm:$0x77] }
 0x45b   :  { %4354 = vmatprep.subr.msk.bf16.mxu1 %vm5199_vm4, %v4352_v57 }
 0x45c   :  { %4357 = vmatpush1.bf16.msk.msra.mxu1 %vm5199_vm4, %v4355_v0 }
 0x45f   :  { %3829 = vmatmul.mubr.msk.f32.vlgmr.msra.gmra.mrb[158].mxu1 %vm3042_vm5, %v5210_v12 }
 0x4f2   :  { %v3146_v61 = vpop.f32.mrb[154].mxu1 }
 0x4f3   :  { %v3147_v62 = vadd.f32 %v3146_v61, %v3021_v60  ;;  %v3148_v40 = vpop.f32.mrb[155].mxu1  ;;  %v3035_v60 = vcombine.high %v3024_v54, %v3024_v54 }
 0x4f4   :  { %v3149_v63 = vadd.f32 %v3148_v40, %v3032_v30 }
 0x4f5   :  { %v3505_v2 = vmul.f32 %v3147_v62, %v3147_v62 }
 0x4f6   :  { %v3506_v3 = vmul.f32 %v3149_v63, %v3149_v63 }
 0x4f7   :  { %v3516_v4 = vsel %vm3046_vm2, %v3505_v2, 0.0 }
 0x4f8   :  { %v3517_v7 = vrot.slane %v3516_v4, 4  ;;  %v3523_v8 = vsel %vm3046_vm2, %v3506_v3, 0.0 }
 0x4f9   :  { %v3524_v10 = vrot.slane %v3523_v8, 4 }
 0x4fa   :  { %v3518_v59 = vadd.f32 %v3517_v7, %v3516_v4 }
 0x4fb   :  { %v3525_v14 = vadd.f32 %v3524_v10, %v3523_v8 }
 0x4fc   :  { %v3519_v15 = vrot.slane %v3518_v59, 2  ;;  %v3217_v12 = vpop.f32.mrb[154].mxu0 }
 0x4fd   :  { %v3526_v16 = vrot.slane %v3525_v14, 2  ;;  %v3218_v35 = vadd.f32 %v3217_v12, %v3022_v5  ;;  %v3219_v48 = vpop.f32.mrb[155].mxu0 }
 0x4fe   :  { %v3520_v58 = vadd.f32 %v3519_v15, %v3518_v59  ;;  %v3220_v9 = vadd.f32 %v3219_v48, %v3033_v13 }
 0x4ff   :  { %v3527_v20 = vadd.f32 %v3526_v16, %v3525_v14  ;;  %v3507_v23 = vmul.f32 %v3218_v35, %v3218_v35  ;;  %v3026_v16 = vld [vmem:[#allocation8 + $0x28] sm:$0x7] }
 0x500   :  { %v3521_v17 = vrot.slane %v3520_v58, 1  ;;  %v3508_v18 = vmul.f32 %v3220_v9, %v3220_v9 }
 0x501   :  { %v3528_v19 = vrot.slane %v3527_v20, 1  ;;  %v3530_v21 = vsel %vm3046_vm2, %v3507_v23, 0.0 }
 0x502   :  { %v3522_v24 = vadd.f32 %v3521_v17, %v3520_v58  ;;  %v3531_v38 = vrot.slane %v3530_v21, 4  ;;  %v3537_v25 = vsel %vm3046_vm2, %v3508_v18, 0.0 }
 0x503   :  { %v3529_v26 = vadd.f32 %v3528_v19, %v3527_v20  ;;  %v3538_v52 = vrot.slane %v3537_v25, 4 }
 0x504   :  { %v3593_v27 = vsel %vm3046_vm2, %v3147_v62, %v3522_v24  ;;  %v3532_v28 = vadd.f32 %v3531_v38, %v3530_v21 }
 0x505   :  { %v3594_v29 = vsel %vm3046_vm2, %v3149_v63, %v3529_v26  ;;  %v3539_v45 = vadd.f32 %v3538_v52, %v3537_v25 }
 0x506   :  { %v3614_v1 = vcombine.low %v3593_v27, %v3594_v29  ;;  %v3533_v11 = vrot.slane %v3532_v28, 2 }
 0x507   :  { %v3540_v33 = vrot.slane %v3539_v45, 2 }
 0x508   :  { %3624 = vst [vmem:[#allocation10] sm:$0xff] %v3614_v1  ;;  %v3534_v47 = vadd.f32 %v3533_v11, %v3532_v28 }
 0x509   :  { %v3541_v31 = vadd.f32 %v3540_v33, %v3539_v45 }
 0x50a   :  { %v3535_v32 = vrot.slane %v3534_v47, 1 }
 0x50b   :  { %v3542_v34 = vrot.slane %v3541_v31, 1 }
 0x50c   :  { %v3536_v36 = vadd.f32 %v3535_v32, %v3534_v47  ;;  %v3025_v47 = vld [vmem:[#allocation8 + $0x20] sm:$0x77] }
 0x50d   :  { %v3543_v56 = vadd.f32 %v3542_v34, %v3541_v31 }
 0x50e   :  { %v3595_v6 = vsel %vm3046_vm2, %v3218_v35, %v3536_v36 }
 0x50f   :  { %v3596_v39 = vsel %vm3046_vm2, %v3220_v9, %v3543_v56 }
 0x510   :  { %v3615_v41 = vcombine.low %v3595_v6, %v3596_v39 }
 0x512   :  { %3625 = vst [vmem:[#allocation10 + $0x8] sm:$0xff] %v3615_v41  ;;  %v3288_v44 = vpop.f32.mrb[156].mxu1 }
 0x513   :  { %v3289_v46 = vadd.f32 %v3288_v44, %v3023_v37  ;;  %v3290_v49 = vpop.f32.mrb[157].mxu1  ;;  %v3036_v37 = vcombine.high %v3025_v47, %v3025_v47 }
 0x514   :  { %v3291_v50 = vadd.f32 %v3290_v49, %v3034_v42 }
 0x515   :  { %v3509_v51 = vmul.f32 %v3289_v46, %v3289_v46 }
 0x516   :  { %v3510_v43 = vmul.f32 %v3291_v50, %v3291_v50 }
 0x517   :  { %v3544_v53 = vsel %vm3046_vm2, %v3509_v51, 0.0 }
 0x518   :  { %v3545_v22 = vrot.slane %v3544_v53, 4  ;;  %v3551_v0 = vsel %vm3046_vm2, %v3510_v43, 0.0 }
 0x519   :  { %v3552_v55 = vrot.slane %v3551_v0, 4 }
 0x51a   :  { %v3546_v57 = vadd.f32 %v3545_v22, %v3544_v53 }
 0x51b   :  { %v3553_v30 = vadd.f32 %v3552_v55, %v3551_v0 }
 0x51c   :  { %v3547_v61 = vrot.slane %v3546_v57, 2  ;;  %v3359_v62 = vpop.f32.mrb[156].mxu0 }
 0x51d   :  { %v3554_v40 = vrot.slane %v3553_v30, 2  ;;  %v3360_v63 = vadd.f32 %v3359_v62, %v3024_v54  ;;  %v3361_v2 = vpop.f32.mrb[157].mxu0 }
 0x51e   :  { %v3548_v3 = vadd.f32 %v3547_v61, %v3546_v57  ;;  %v3362_v4 = vadd.f32 %v3361_v2, %v3035_v60 }
 0x51f   :  { %v3555_v5 = vadd.f32 %v3554_v40, %v3553_v30  ;;  %v3511_v7 = vmul.f32 %v3360_v63, %v3360_v63 }
 0x520   :  { %v3549_v8 = vrot.slane %v3548_v3, 1  ;;  %v3512_v10 = vmul.f32 %v3362_v4, %v3362_v4 }
 0x521   :  { %v3556_v59 = vrot.slane %v3555_v5, 1  ;;  %v3558_v13 = vsel %vm3046_vm2, %v3511_v7, 0.0 }
 0x522   :  { %v3550_v14 = vadd.f32 %v3549_v8, %v3548_v3  ;;  %v3559_v15 = vrot.slane %v3558_v13, 4  ;;  %v3565_v12 = vsel %vm3046_vm2, %v3512_v10, 0.0 }
 0x523   :  { %v3557_v35 = vadd.f32 %v3556_v59, %v3555_v5  ;;  %v3566_v48 = vrot.slane %v3565_v12, 4 }
 0x524   :  { %v3597_v58 = vsel %vm3046_vm2, %v3289_v46, %v3550_v14  ;;  %v3560_v9 = vadd.f32 %v3559_v15, %v3558_v13  ;;  %v3501_v20 = vpop.f32.mrb[158].mxu0 }
 0x525   :  { %v3598_v23 = vsel %vm3046_vm2, %v3291_v50, %v3557_v35  ;;  %v3567_v17 = vadd.f32 %v3566_v48, %v3565_v12  ;;  %v3502_v18 = vadd.f32 %v3501_v20, %v3026_v16  ;;  %v3995_v19 = vpop.f32.mrb[159].mxu0 }
 0x526   :  { %v3616_v21 = vcombine.low %v3597_v58, %v3598_v23  ;;  %v3561_v24 = vrot.slane %v3560_v9, 2 }
 0x527   :  { %v3568_v38 = vrot.slane %v3567_v17, 2  ;;  %v3515_v25 = vmul.f32 %v3502_v18, %v3502_v18 }
 0x528   :  { %3626 = vst [vmem:[#allocation10 + $0x10] sm:$0xff] %v3616_v21  ;;  %v3562_v26 = vadd.f32 %v3561_v24, %v3560_v9 }
 0x529   :  { %v3569_v52 = vadd.f32 %v3568_v38, %v3567_v17  ;;  %v3586_v27 = vsel %vm3046_vm2, %v3515_v25, 0.0 }
 0x52a   :  { %v3563_v28 = vrot.slane %v3562_v26, 1  ;;  %v3587_v29 = vrot.slane %v3586_v27, 4 }
 0x52b   :  { %v3570_v45 = vrot.slane %v3569_v52, 1 }
 0x52c   :  { %v3564_v1 = vadd.f32 %v3563_v28, %v3562_v26  ;;  %v3588_v11 = vadd.f32 %v3587_v29, %v3586_v27 }
 0x52d   :  { %v3571_v33 = vadd.f32 %v3570_v45, %v3569_v52 }
 0x52e   :  { %v3599_v31 = vsel %vm3046_vm2, %v3360_v63, %v3564_v1  ;;  %v3589_v32 = vrot.slane %v3588_v11, 2 }
 0x52f   :  { %v3600_v34 = vsel %vm3046_vm2, %v3362_v4, %v3571_v33 }
 0x530   :  { %v3617_v36 = vcombine.low %v3599_v31, %v3600_v34  ;;  %v3590_v56 = vadd.f32 %v3589_v32, %v3588_v11 }
 0x532   :  { %3627 = vst [vmem:[#allocation10 + $0x18] sm:$0xff] %v3617_v36  ;;  %v3591_v6 = vrot.slane %v3590_v56, 1  ;;  %v3430_v39 = vpop.f32.mrb[158].mxu1 }
 0x533   :  { %v3431_v41 = vadd.f32 %v3430_v39, %v3025_v47  ;;  %v3432_v42 = vpop.f32.mrb[159].mxu1 }
 0x534   :  { %v3592_v44 = vadd.f32 %v3591_v6, %v3590_v56  ;;  %v3433_v46 = vadd.f32 %v3432_v42, %v3036_v37 }
 0x535   :  { %v3513_v49 = vmul.f32 %v3431_v41, %v3431_v41 }
 0x536   :  { %v3603_v50 = vsel %vm3046_vm2, %v3502_v18, %v3592_v44  ;;  %v3514_v51 = vmul.f32 %v3433_v46, %v3433_v46 }
 0x537   :  { %3629 = vst [vmem:[#allocation10 + $0x28] sm:$0xf] %v3603_v50  ;;  %v3572_v43 = vsel %vm3046_vm2, %v3513_v49, 0.0 }
 0x538   :  { %v3573_v53 = vrot.slane %v3572_v43, 4  ;;  %v3579_v54 = vsel %vm3046_vm2, %v3514_v51, 0.0 }
 0x539   :  { %v3580_v22 = vrot.slane %v3579_v54, 4 }
 0x53a   :  { %v3574_v0 = vadd.f32 %v3573_v53, %v3572_v43 }
 0x53b   :  { %v3581_v55 = vadd.f32 %v3580_v22, %v3579_v54 }
 0x53c   :  { %v3575_v57 = vrot.slane %v3574_v0, 2 }
 0x53d   :  { %v3582_v60 = vrot.slane %v3581_v55, 2 }
 0x53e   :  { %v3576_v30 = vadd.f32 %v3575_v57, %v3574_v0 }
 0x53f   :  { %v3583_v61 = vadd.f32 %v3582_v60, %v3581_v55 }
 0x540   :  { %v3577_v62 = vrot.slane %v3576_v30, 1 }
 0x541   :  { %v3584_v40 = vrot.slane %v3583_v61, 1 }
 0x542   :  { %v3578_v63 = vadd.f32 %v3577_v62, %v3576_v30 }
 0x543   :  { %v3585_v2 = vadd.f32 %v3584_v40, %v3583_v61 }
 0x544   :  { %v3601_v3 = vsel %vm3046_vm2, %v3431_v41, %v3578_v63 }
 0x545   :  { %v3602_v4 = vsel %vm3046_vm2, %v3433_v46, %v3585_v2 }
 0x546   :  { %v3618_v5 = vcombine.low %v3601_v3, %v3602_v4 }
 0x548   :  { %3628 = vst [vmem:[#allocation10 + $0x20] sm:$0xff] %v3618_v5 }
 0x549   :  { %4484 = shalt.err (!%p4481_p8)
}
 0x54a   :  { %s4485_s13 = scalar_lea.hbm %s5287_s7, 704 }
 0x54b   :  { %p4486_p9 = scmp.ne.s32.totalorder %s5287_s7, %s4485_s13  ;;  %p4489_p10 = scmp.lt.u32.totalorder %s4485_s13, %s5287_s7 }
 0x54d   :  { %p4491_p11 = pnand %p4489_p10, %p4486_p9 }
 0x54f   :  { %4494 = shalt.err (!%p4491_p11)
}
 0x550   :  { %3639 = dma.vmem_to_hbm [thread:$0]  %s3637_s30, 704, %s5287_s7, [#allocation4]  }
 0x551   :  { %4501 = dma.done.wait [#allocation4], 704  }
 0x552   :  { %4502 = vsyncadd [#allocation4], 4294966592 }
 0x553   :  { %3643 = vsyncpa [#allocation3], 1 }
 0x554   :  { %3644 = vsyncpa [#allocation6], 1 }
 0x555   :  { %3645 = vsyncpa [#allocation9], 1 }
 0x556   :  { %3646 = vsyncpa [#allocation4], 1 }

</bundles_post_ra>
